<compile_context>
chip_gen: v7x
topology: tpu7x:2x2x1
jax: 0.10.0
libtpu: 0.0.40
codegen_flags: <defaults>
</compile_context>

<pallas_src>
import jax
import jax.numpy as jnp
from jax import lax
from jax.experimental import pallas as pl
from jax.experimental.pallas import tpu as pltpu

EPS = 1e-12
P_DROP = 0.1
H = 128
# keep iff bits >= floor(p * 2^32)  ->  P(keep) = 1 - p
KEEP_THRESH = int(P_DROP * (1 << 32))  # 429496729


def ln_dropout_kernel(x_ref, g_ref, b_ref, bits_ref, o_ref):
    # ---- LayerNorm over the last (lane) axis, H = 128 ----
    x = x_ref[...].astype(jnp.float32)                       # (rows, H)
    # Two independent lane reductions (pipeline on the XLU).
    s1 = jnp.sum(x, axis=-1, keepdims=True)
    s2 = jnp.sum(x * x, axis=-1, keepdims=True)
    mean = s1 * (1.0 / H)
    var = jnp.maximum(s2 * (1.0 / H) - mean * mean, 0.0)     # biased var (PyTorch LayerNorm)
    inv = lax.rsqrt(var + EPS)
    # gamma/beta already pre-scaled by 1/(1-p) in the wrapper.
    y = (x - mean) * inv * g_ref[...] + b_ref[...]

    # ---- Dropout(p=0.1), training-mode semantics: integer-domain threshold ----
    # TODO(synk): RNG stream cannot bit-match torch's dropout mask; keep probability matches.
    keep = bits_ref[...] >= jnp.uint32(KEEP_THRESH)
    o_ref[...] = jnp.where(keep, y, 0.0).astype(o_ref.dtype)


def layernorm_dropout(x, gamma, beta, key):
    B, S, h = x.shape
    assert h == H
    rows = B * S
    assert rows % 8 == 0
    x2 = x.reshape(rows, H)

    # Fold dropout scale 1/(1-p) into the affine params (vector-sized, free).
    scale = 1.0 / (1.0 - P_DROP)
    g2 = (gamma.astype(jnp.float32) * scale).reshape(1, H)
    b2 = (beta.astype(jnp.float32) * scale).reshape(1, H)

    # Uniform uint32 bits for the dropout mask (generated outside the kernel so it
    # lowers on both TPU and interpret backends).
    bits = jax.random.bits(key, (rows, H), dtype=jnp.uint32)

    out = pl.pallas_call(
        ln_dropout_kernel,
        out_shape=jax.ShapeDtypeStruct((rows, H), x.dtype),
        grid_spec=pl.GridSpec(
            grid=(1,),  # single step: whole problem fits comfortably in VMEM
            in_specs=[
                pl.BlockSpec((rows, H), lambda i: (0, 0)),
                pl.BlockSpec((1, H), lambda i: (0, 0)),
                pl.BlockSpec((1, H), lambda i: (0, 0)),
                pl.BlockSpec((rows, H), lambda i: (0, 0)),
            ],
            out_specs=pl.BlockSpec((rows, H), lambda i: (0, 0)),
        ),
        compiler_params=pltpu.CompilerParams(
            dimension_semantics=("arbitrary",),
        ),
    )(x2, g2, b2, bits)
    return out.reshape(B, S, H)


if __name__ == "__main__":
    key = jax.random.PRNGKey(0)
    k_x, k_drop = jax.random.split(key)
    # Shapes implied by the module: x26 = randn([1, 384, 128])
    x = jax.random.normal(k_x, (1, 384, 128), dtype=jnp.float32)
    # PyTorch LayerNorm default init: weight=1, bias=0
    gamma = jnp.ones((128,), dtype=jnp.float32)
    beta = jnp.zeros((128,), dtype=jnp.float32)

    out = layernorm_dropout(x, gamma, beta, k_drop)
    jax.block_until_ready(out)
    assert out.shape == (1, 384, 128) and out.dtype == jnp.float32
    print("KERNEL_OK")
</pallas_src>

<mosaic_0001>
module attributes {stable_mosaic.version = 11 : i64} {
  func.func @ln_dropout_kernel(%arg0: i32, %arg1: memref<384x128xf32, #tpu.memory_space<vmem>>, %arg2: memref<1x128xf32, #tpu.memory_space<vmem>>, %arg3: memref<1x128xf32, #tpu.memory_space<vmem>>, %arg4: memref<384x128xi32, #tpu.memory_space<vmem>>, %arg5: memref<384x128xf32, #tpu.memory_space<vmem>>) attributes {dimension_semantics = [#tpu.dimension_semantics<arbitrary>], iteration_bounds = array<i64: 1>, scalar_prefetch = 0 : i64, scratch_operands = 0 : i64, tpu.core_type = #tpu.core_type<tc>, window_params = [{pipeline_mode = #tpu.pipeline_mode<synchronous>, transform_indices = @transform_0, window_bounds = array<i64: 384, 128>}, {pipeline_mode = #tpu.pipeline_mode<synchronous>, transform_indices = @transform_1, window_bounds = array<i64: 1, 128>}, {pipeline_mode = #tpu.pipeline_mode<synchronous>, transform_indices = @transform_2, window_bounds = array<i64: 1, 128>}, {pipeline_mode = #tpu.pipeline_mode<synchronous>, transform_indices = @transform_3, window_bounds = array<i64: 384, 128>}, {pipeline_mode = #tpu.pipeline_mode<synchronous>, transform_indices = @transform_4, window_bounds = array<i64: 384, 128>}]} {
    %c0 = arith.constant 0 : index
    %c0_0 = arith.constant 0 : index
    %0 = vector.load %arg1[%c0, %c0_0] : memref<384x128xf32, #tpu.memory_space<vmem>>, vector<384x128xf32>
    %cst = arith.constant dense<0.000000e+00> : vector<384xf32>
    %1 = vector.multi_reduction <add>, %0, %cst [1] : vector<384x128xf32> to vector<384xf32>
    %2 = vector.shape_cast %1 : vector<384xf32> to vector<384x1xf32>
    %3 = arith.mulf %0, %0 : vector<384x128xf32>
    %cst_1 = arith.constant dense<0.000000e+00> : vector<384xf32>
    %4 = vector.multi_reduction <add>, %3, %cst_1 [1] : vector<384x128xf32> to vector<384xf32>
    %5 = vector.shape_cast %4 : vector<384xf32> to vector<384x1xf32>
    %cst_2 = arith.constant 7.812500e-03 : f32
    %6 = vector.broadcast %cst_2 : f32 to vector<384x1xf32>
    %7 = arith.mulf %2, %6 : vector<384x1xf32>
    %cst_3 = arith.constant 7.812500e-03 : f32
    %8 = vector.broadcast %cst_3 : f32 to vector<384x1xf32>
    %9 = arith.mulf %5, %8 : vector<384x1xf32>
    %10 = arith.mulf %7, %7 : vector<384x1xf32>
    %11 = arith.subf %9, %10 : vector<384x1xf32>
    %cst_4 = arith.constant 0.000000e+00 : f32
    %12 = vector.broadcast %cst_4 : f32 to vector<384x1xf32>
    %13 = arith.maximumf %11, %12 : vector<384x1xf32>
    %cst_5 = arith.constant 9.99999996E-13 : f32
    %14 = vector.broadcast %cst_5 : f32 to vector<384x1xf32>
    %15 = arith.addf %13, %14 : vector<384x1xf32>
    %16 = math.rsqrt %15 : vector<384x1xf32>
    %17 = vector.broadcast %7 : vector<384x1xf32> to vector<384x128xf32>
    %18 = arith.subf %0, %17 : vector<384x128xf32>
    %19 = vector.broadcast %16 : vector<384x1xf32> to vector<384x128xf32>
    %20 = arith.mulf %18, %19 : vector<384x128xf32>
    %c0_6 = arith.constant 0 : index
    %c0_7 = arith.constant 0 : index
    %21 = vector.load %arg2[%c0_6, %c0_7] : memref<1x128xf32, #tpu.memory_space<vmem>>, vector<1x128xf32>
    %22 = vector.broadcast %21 : vector<1x128xf32> to vector<384x128xf32>
    %23 = arith.mulf %20, %22 : vector<384x128xf32>
    %c0_8 = arith.constant 0 : index
    %c0_9 = arith.constant 0 : index
    %24 = vector.load %arg3[%c0_8, %c0_9] : memref<1x128xf32, #tpu.memory_space<vmem>>, vector<1x128xf32>
    %25 = vector.broadcast %24 : vector<1x128xf32> to vector<384x128xf32>
    %26 = arith.addf %23, %25 : vector<384x128xf32>
    %c0_10 = arith.constant 0 : index
    %c0_11 = arith.constant 0 : index
    %27 = vector.load %arg4[%c0_10, %c0_11] : memref<384x128xi32, #tpu.memory_space<vmem>>, vector<384x128xi32>
    %c429496729_i32 = arith.constant 429496729 : i32
    %28 = vector.broadcast %c429496729_i32 : i32 to vector<384x128xi32>
    %29 = arith.cmpi uge, %27, %28 : vector<384x128xi32>
    %cst_12 = arith.constant 0.000000e+00 : f32
    %30 = vector.broadcast %cst_12 : f32 to vector<384x128xf32>
    %31 = arith.select %29, %26, %30 : vector<384x128xi1>, vector<384x128xf32>
    %c0_13 = arith.constant 0 : index
    %c0_14 = arith.constant 0 : index
    %32 = vector.load %arg5[%c0_13, %c0_14] : memref<384x128xf32, #tpu.memory_space<vmem>>, vector<384x128xf32>
    tpu.vector_store %arg5[%c0_13, %c0_14], %31 {strides = array<i32>} : memref<384x128xf32, #tpu.memory_space<vmem>>, vector<384x128xf32>,
    return
  }
  func.func @transform_0(%arg0: i32) -> (i32, i32) {
    %c0_i32 = arith.constant 0 : i32
    %c0_i32_0 = arith.constant 0 : i32
    %c0_i32_1 = arith.constant 0 : i32
    return %c0_i32, %c0_i32_0 : i32, i32
  }
  func.func @transform_1(%arg0: i32) -> (i32, i32) {
    %c0_i32 = arith.constant 0 : i32
    %c0_i32_0 = arith.constant 0 : i32
    %c0_i32_1 = arith.constant 0 : i32
    return %c0_i32, %c0_i32_0 : i32, i32
  }
  func.func @transform_2(%arg0: i32) -> (i32, i32) {
    %c0_i32 = arith.constant 0 : i32
    %c0_i32_0 = arith.constant 0 : i32
    %c0_i32_1 = arith.constant 0 : i32
    return %c0_i32, %c0_i32_0 : i32, i32
  }
  func.func @transform_3(%arg0: i32) -> (i32, i32) {
    %c0_i32 = arith.constant 0 : i32
    %c0_i32_0 = arith.constant 0 : i32
    %c0_i32_1 = arith.constant 0 : i32
    return %c0_i32, %c0_i32_0 : i32, i32
  }
  func.func @transform_4(%arg0: i32) -> (i32, i32) {
    %c0_i32 = arith.constant 0 : i32
    %c0_i32_0 = arith.constant 0 : i32
    %c0_i32_1 = arith.constant 0 : i32
    return %c0_i32, %c0_i32_0 : i32, i32
  }
}

</mosaic_0001>

<bundles_post_ra>
// kernel: tpu_custom_call.1
= control target key start
LH: loop header
LB: loop body
LE: loop exit
PB: predicated region body
PF: predicated region fallthrough
CT: control target
= control target key end

     0   :  { %9 = vsyncpa [#allocation3], 0  ;;  %s2590_s0 = inlined_call_operand.hbm [shape: f32[384,128], index: 0, kind: input, shape index: {}]   ;;  %s2591_s1 = inlined_call_operand.vmem [shape: f32[1,128], index: 1, kind: input, shape index: {}]   ;;  %s2592_s2 = inlined_call_operand.vmem [shape: f32[1,128], index: 2, kind: input, shape index: {}]   ;;  %s2593_s3 = inlined_call_operand.hbm [shape: u32[384,128], index: 3, kind: input, shape index: {}]   ;;  %s2594_s4 = inlined_call_operand.hbm [shape: f32[384,128], index: 4, kind: output, shape index: {}]  }
   0x1   :  { %10 = vsyncpa [#allocation6], 0 }
   0x2   :  { %11 = vsyncpa [#allocation4], 0  ;;  %s1270_s15 = smov [#allocation2]   ;;  %s1198_s19 = scalar_lea.hbm %s2590_s0, 6144 }
   0x3   :  { %s17_s16 = sshll.u32 %s1270_s15, 4  ;;  %p1199_p0 = scmp.ne.s32.totalorder %s2590_s0, %s1198_s19  ;;  %s18_s16 = int_to_ptr.vmem [resolvable:$true] %s17_s16 }
   0x4   :  { %p1202_p1 = scmp.lt.u32.totalorder %s1198_s19, %s2590_s0 }
   0x6   :  { %p1204_p2 = pnand %p1202_p1, %p1199_p0 }
   0x8   :  { %1207 = shalt.err (!%p1204_p2)
}
   0x9   :  { %s1208_s24 = scalar_lea.vmem %s18_s16, 6144  ;;  %p1213_p4 = scmp.lt.s32.totalorder %s18_s16, %s18_s16 }
   0xa   :  { %p1209_p3 = scmp.ne.s32.totalorder %s18_s16, %s1208_s24  ;;  %p1214_p5 = scmp.lt.s32.totalorder %s1208_s24, %s1208_s24 }
   0xc   :  { %p1215_p6 = por %p1214_p5, %p1213_p4 }
   0xe   :  { %p1216_p7 = pnand %p1215_p6, %p1209_p3 }
  0x10   :  { %1219 = shalt.err (!%p1216_p7)
}
  0x11   :  { %s1271_s25 = smov 128   ;;  %s1272_s26 = smov 8  }
  0x12   :  { %23 = dma.hbm_to_vmem [thread:$0]  %s2590_s0, 6144, %s18_s16, [#allocation3], %s1271_s25, %s1271_s25, %s1272_s26  }
  0x13   :  { %s1273_s29 = smov [#allocation5]   ;;  %s1220_s7 = scalar_lea.hbm %s2593_s3, 6144 }
  0x14   :  { %s33_s30 = sshll.u32 %s1273_s29, 4  ;;  %p1221_p8 = scmp.ne.s32.totalorder %s2593_s3, %s1220_s7  ;;  %s34_s30 = int_to_ptr.vmem [resolvable:$true] %s33_s30 }
  0x15   :  { %p1224_p9 = scmp.lt.u32.totalorder %s1220_s7, %s2593_s3 }
  0x17   :  { %p1226_p10 = pnand %p1224_p9, %p1221_p8 }
  0x19   :  { %1229 = shalt.err (!%p1226_p10)
}
  0x1a   :  { %s1230_s12 = scalar_lea.vmem %s34_s30, 6144  ;;  %p1235_p12 = scmp.lt.s32.totalorder %s34_s30, %s34_s30 }
  0x1b   :  { %p1231_p11 = scmp.ne.s32.totalorder %s34_s30, %s1230_s12  ;;  %p1236_p13 = scmp.lt.s32.totalorder %s1230_s12, %s1230_s12 }
  0x1d   :  { %p1237_p0 = por %p1236_p13, %p1235_p12 }
  0x1f   :  { %p1238_p1 = pnand %p1237_p0, %p1231_p11 }
  0x21   :  { %1241 = shalt.err (!%p1238_p1)
}
  0x22   :  { %39 = dma.hbm_to_vmem [thread:$0]  %s2593_s3, 6144, %s34_s30, [#allocation6], %s1271_s25, %s1271_s25, %s1272_s26  }
  0x23   :  { %1264 = dma.done.wait [#allocation3], 6144  }
  0x24   :  { %1265 = vsyncadd [#allocation3], 4294961152 }
  0x25   :  { %1266 = dma.done.wait [#allocation6], 6144  }
  0x26   :  { %1267 = vsyncadd [#allocation6], 4294961152  ;;  %v1330_v0 = vld [vmem:[#allocation2 + $0x10] sm:$0xff]  ;;  %v1332_v1 = vld [vmem:[#allocation2] sm:$0xff] }
  0x27   :  { %2689 = vst [vmem:[#allocation11_spill] sm:$0xff] %v1330_v0  ;;  %2690 = vst [vmem:[#allocation12_spill] sm:$0xff] %v1332_v1  ;;  %98 = vadd.xlane.f32.xlu1 %v1330_v0  ;;  %94 = vadd.xlane.f32.xlu0 %v1332_v1  ;;  %v1336_v2 = vld [vmem:[#allocation2 + $0x18] sm:$0xff]  ;;  %v1338_v3 = vld [vmem:[#allocation2 + $0x8] sm:$0xff]  ;;  %v190_v49 = vmul.f32 %v1332_v1, %v1332_v1  ;;  %v192_v51 = vmul.f32 %v1330_v0, %v1330_v0 }
  0x28   :  { %2691 = vst [vmem:[#allocation13_spill] sm:$0xff] %v1336_v2  ;;  %v1342_v4 = vld [vmem:[#allocation2 + $0x28] sm:$0xff]  ;;  %v1344_v5 = vld [vmem:[#allocation2 + $0x20] sm:$0xff]  ;;  %v1348_v6 = vld [vmem:[#allocation2 + $0x38] sm:$0xff]  ;;  %v191_v48 = vmul.f32 %v1338_v3, %v1338_v3  ;;  %v193_v50 = vmul.f32 %v1336_v2, %v1336_v2 }
  0x29   :  { %v1350_v7 = vld [vmem:[#allocation2 + $0x30] sm:$0xff]  ;;  %v1354_v8 = vld [vmem:[#allocation2 + $0x48] sm:$0xff]  ;;  %v1356_v9 = vld [vmem:[#allocation2 + $0x40] sm:$0xff]  ;;  %v195_v52 = vmul.f32 %v1342_v4, %v1342_v4  ;;  %v194_v53 = vmul.f32 %v1344_v5, %v1344_v5  ;;  %v197_v54 = vmul.f32 %v1348_v6, %v1348_v6 }
  0x2a   :  { %2692 = vst [vmem:[#allocation14_spill] sm:$0xff] %v1350_v7  ;;  %2693 = vst [vmem:[#allocation15_spill] sm:$0xff] %v1354_v8  ;;  %v1360_v10 = vld [vmem:[#allocation2 + $0x58] sm:$0xff]  ;;  %v1362_v11 = vld [vmem:[#allocation2 + $0x50] sm:$0xff]  ;;  %v196_v55 = vmul.f32 %v1350_v7, %v1350_v7  ;;  %v199_v56 = vmul.f32 %v1354_v8, %v1354_v8  ;;  %v198_v57 = vmul.f32 %v1356_v9, %v1356_v9 }
  0x2b   :  { %100 = vadd.xlane.f32.xlu1 %v1336_v2  ;;  %96 = vadd.xlane.f32.xlu0 %v1338_v3  ;;  %v1366_v12 = vld [vmem:[#allocation2 + $0x68] sm:$0xff]  ;;  %v1368_v13 = vld [vmem:[#allocation2 + $0x60] sm:$0xff]  ;;  %v1372_v14 = vld [vmem:[#allocation2 + $0x78] sm:$0xff]  ;;  %v201_v58 = vmul.f32 %v1360_v10, %v1360_v10  ;;  %v200_v59 = vmul.f32 %v1362_v11, %v1362_v11 }
  0x2c   :  { %2694 = vst [vmem:[#allocation16_spill] sm:$0xff] %v1368_v13  ;;  %2695 = vst [vmem:[#allocation17_spill] sm:$0xff] %v1372_v14  ;;  %v1374_v15 = vld [vmem:[#allocation2 + $0x70] sm:$0xff]  ;;  %v1378_v16 = vld [vmem:[#allocation2 + $0x88] sm:$0xff]  ;;  %v203_v60 = vmul.f32 %v1366_v12, %v1366_v12  ;;  %v202_v61 = vmul.f32 %v1368_v13, %v1368_v13  ;;  %v205_v62 = vmul.f32 %v1372_v14, %v1372_v14 }
  0x2d   :  { %v1380_v17 = vld [vmem:[#allocation2 + $0x80] sm:$0xff]  ;;  %v1384_v18 = vld [vmem:[#allocation2 + $0x98] sm:$0xff]  ;;  %v1386_v19 = vld [vmem:[#allocation2 + $0x90] sm:$0xff]  ;;  %v204_v63 = vmul.f32 %v1374_v15, %v1374_v15 }
  0x2e   :  { %2696 = vst [vmem:[#allocation18_spill] sm:$0xff] %v1380_v17  ;;  %2697 = vst [vmem:[#allocation19_spill] sm:$0xff] %v1384_v18  ;;  %v1390_v20 = vld [vmem:[#allocation2 + $0xa8] sm:$0xff]  ;;  %v1392_v21 = vld [vmem:[#allocation2 + $0xa0] sm:$0xff] }
  0x2f   :  { %104 = vadd.xlane.f32.xlu1 %v1342_v4  ;;  %102 = vadd.xlane.f32.xlu0 %v1344_v5  ;;  %2698 = vst [vmem:[#allocation20_spill] sm:$0xff] %v1386_v19  ;;  %2699 = vst [vmem:[#allocation21_spill] sm:$0xff] %v1390_v20  ;;  %v1396_v22 = vld [vmem:[#allocation2 + $0xb8] sm:$0xff]  ;;  %v1398_v23 = vld [vmem:[#allocation2 + $0xb0] sm:$0xff] }
  0x30   :  { %2700 = vst [vmem:[#allocation22_spill] sm:$0xff] %v1392_v21  ;;  %2701 = vst [vmem:[#allocation23_spill] sm:$0xff] %v1396_v22  ;;  %v1402_v24 = vld [vmem:[#allocation2 + $0xc8] sm:$0xff]  ;;  %v1404_v25 = vld [vmem:[#allocation2 + $0xc0] sm:$0xff] }
  0x31   :  { %2702 = vst [vmem:[#allocation24_spill] sm:$0xff] %v1398_v23  ;;  %2703 = vst [vmem:[#allocation25_spill] sm:$0xff] %v1402_v24  ;;  %v1408_v26 = vld [vmem:[#allocation2 + $0xd8] sm:$0xff]  ;;  %v1410_v27 = vld [vmem:[#allocation2 + $0xd0] sm:$0xff] }
  0x32   :  { %2704 = vst [vmem:[#allocation26_spill] sm:$0xff] %v1404_v25  ;;  %2705 = vst [vmem:[#allocation27_spill] sm:$0xff] %v1408_v26  ;;  %v1414_v28 = vld [vmem:[#allocation2 + $0xe8] sm:$0xff]  ;;  %v1416_v29 = vld [vmem:[#allocation2 + $0xe0] sm:$0xff] }
  0x33   :  { %108 = vadd.xlane.f32.xlu1 %v1348_v6  ;;  %106 = vadd.xlane.f32.xlu0 %v1350_v7  ;;  %2706 = vst [vmem:[#allocation28_spill] sm:$0xff] %v1410_v27  ;;  %2707 = vst [vmem:[#allocation29_spill] sm:$0xff] %v1414_v28  ;;  %v1420_v30 = vld [vmem:[#allocation2 + $0xf8] sm:$0xff]  ;;  %v1422_v31 = vld [vmem:[#allocation2 + $0xf0] sm:$0xff] }
  0x34   :  { %2708 = vst [vmem:[#allocation30_spill] sm:$0xff] %v1416_v29  ;;  %2709 = vst [vmem:[#allocation31_spill] sm:$0xff] %v1420_v30  ;;  %v1426_v32 = vld [vmem:[#allocation2 + $0x108] sm:$0xff]  ;;  %v1428_v33 = vld [vmem:[#allocation2 + $0x100] sm:$0xff] }
  0x35   :  { %2710 = vst [vmem:[#allocation32_spill] sm:$0xff] %v1422_v31  ;;  %2711 = vst [vmem:[#allocation33_spill] sm:$0xff] %v1426_v32  ;;  %v1432_v34 = vld [vmem:[#allocation2 + $0x118] sm:$0xff]  ;;  %v1434_v35 = vld [vmem:[#allocation2 + $0x110] sm:$0xff] }
  0x36   :  { %2712 = vst [vmem:[#allocation34_spill] sm:$0xff] %v1428_v33  ;;  %2713 = vst [vmem:[#allocation35_spill] sm:$0xff] %v1432_v34  ;;  %v1438_v36 = vld [vmem:[#allocation2 + $0x128] sm:$0xff]  ;;  %v1440_v37 = vld [vmem:[#allocation2 + $0x120] sm:$0xff] }
  0x37   :  { %112 = vadd.xlane.f32.xlu1 %v1354_v8  ;;  %110 = vadd.xlane.f32.xlu0 %v1356_v9  ;;  %2714 = vst [vmem:[#allocation36_spill] sm:$0xff] %v1434_v35  ;;  %2715 = vst [vmem:[#allocation37_spill] sm:$0xff] %v1438_v36  ;;  %v1444_v38 = vld [vmem:[#allocation2 + $0x138] sm:$0xff]  ;;  %v1446_v39 = vld [vmem:[#allocation2 + $0x130] sm:$0xff] }
  0x38   :  { %2716 = vst [vmem:[#allocation38_spill] sm:$0xff] %v1440_v37  ;;  %2717 = vst [vmem:[#allocation39_spill] sm:$0xff] %v1444_v38  ;;  %v1450_v40 = vld [vmem:[#allocation2 + $0x148] sm:$0xff]  ;;  %v1452_v41 = vld [vmem:[#allocation2 + $0x140] sm:$0xff] }
  0x39   :  { %2718 = vst [vmem:[#allocation40_spill] sm:$0xff] %v1446_v39  ;;  %2719 = vst [vmem:[#allocation41_spill] sm:$0xff] %v1450_v40  ;;  %v1456_v42 = vld [vmem:[#allocation2 + $0x158] sm:$0xff]  ;;  %v1458_v43 = vld [vmem:[#allocation2 + $0x150] sm:$0xff] }
  0x3a   :  { %v1462_v44 = vld [vmem:[#allocation2 + $0x168] sm:$0xff]  ;;  %v1464_v45 = vld [vmem:[#allocation2 + $0x160] sm:$0xff]  ;;  %v1468_v46 = vld [vmem:[#allocation2 + $0x178] sm:$0xff] }
  0x3b   :  { %116 = vadd.xlane.f32.xlu1 %v1360_v10  ;;  %114 = vadd.xlane.f32.xlu0 %v1362_v11  ;;  %v1470_v47 = vld [vmem:[#allocation2 + $0x170] sm:$0xff] }
  0x3f   :  { %120 = vadd.xlane.f32.xlu1 %v1366_v12  ;;  %118 = vadd.xlane.f32.xlu0 %v1368_v13 }
  0x43   :  { %124 = vadd.xlane.f32.xlu1 %v1372_v14  ;;  %122 = vadd.xlane.f32.xlu0 %v1374_v15 }
  0x47   :  { %128 = vadd.xlane.f32.xlu1 %v1378_v16  ;;  %126 = vadd.xlane.f32.xlu0 %v1380_v17 }
  0x4b   :  { %132 = vadd.xlane.f32.xlu1 %v1384_v18  ;;  %130 = vadd.xlane.f32.xlu0 %v1386_v19 }
  0x4f   :  { %136 = vadd.xlane.f32.xlu1 %v1390_v20  ;;  %134 = vadd.xlane.f32.xlu0 %v1392_v21 }
  0x53   :  { %140 = vadd.xlane.f32.xlu1 %v1396_v22  ;;  %138 = vadd.xlane.f32.xlu0 %v1398_v23 }
  0x57   :  { %144 = vadd.xlane.f32.xlu1 %v1402_v24  ;;  %142 = vadd.xlane.f32.xlu0 %v1404_v25 }
  0x5b   :  { %148 = vadd.xlane.f32.xlu1 %v1408_v26  ;;  %146 = vadd.xlane.f32.xlu0 %v1410_v27 }
  0x5f   :  { %152 = vadd.xlane.f32.xlu1 %v1414_v28  ;;  %150 = vadd.xlane.f32.xlu0 %v1416_v29 }
  0x63   :  { %156 = vadd.xlane.f32.xlu1 %v1420_v30  ;;  %154 = vadd.xlane.f32.xlu0 %v1422_v31 }
  0x67   :  { %160 = vadd.xlane.f32.xlu1 %v1426_v32  ;;  %158 = vadd.xlane.f32.xlu0 %v1428_v33 }
  0x6b   :  { %164 = vadd.xlane.f32.xlu1 %v1432_v34  ;;  %162 = vadd.xlane.f32.xlu0 %v1434_v35 }
  0x6f   :  { %168 = vadd.xlane.f32.xlu1 %v1438_v36  ;;  %166 = vadd.xlane.f32.xlu0 %v1440_v37 }
  0x73   :  { %172 = vadd.xlane.f32.xlu1 %v1444_v38  ;;  %170 = vadd.xlane.f32.xlu0 %v1446_v39 }
  0x77   :  { %176 = vadd.xlane.f32.xlu1 %v1450_v40  ;;  %174 = vadd.xlane.f32.xlu0 %v1452_v41 }
  0x7b   :  { %180 = vadd.xlane.f32.xlu1 %v1456_v42  ;;  %178 = vadd.xlane.f32.xlu0 %v1458_v43 }
  0x7f   :  { %184 = vadd.xlane.f32.xlu1 %v1462_v44  ;;  %182 = vadd.xlane.f32.xlu0 %v1464_v45 }
  0x83   :  { %188 = vadd.xlane.f32.xlu1 %v1468_v46  ;;  %186 = vadd.xlane.f32.xlu0 %v1470_v47 }
  0x87   :  { %240 = vadd.xlane.f32.xlu1 %v191_v48  ;;  %238 = vadd.xlane.f32.xlu0 %v190_v49  ;;  %v207_v48 = vmul.f32 %v1378_v16, %v1378_v16  ;;  %v206_v49 = vmul.f32 %v1380_v17, %v1380_v17 }
  0x8b   :  { %244 = vadd.xlane.f32.xlu1 %v193_v50  ;;  %242 = vadd.xlane.f32.xlu0 %v192_v51  ;;  %v209_v50 = vmul.f32 %v1384_v18, %v1384_v18  ;;  %v208_v51 = vmul.f32 %v1386_v19, %v1386_v19 }
  0x8f   :  { %248 = vadd.xlane.f32.xlu1 %v195_v52  ;;  %246 = vadd.xlane.f32.xlu0 %v194_v53  ;;  %v211_v52 = vmul.f32 %v1390_v20, %v1390_v20  ;;  %v210_v53 = vmul.f32 %v1392_v21, %v1392_v21 }
  0x93   :  { %252 = vadd.xlane.f32.xlu1 %v197_v54  ;;  %250 = vadd.xlane.f32.xlu0 %v196_v55  ;;  %v213_v54 = vmul.f32 %v1396_v22, %v1396_v22  ;;  %v212_v55 = vmul.f32 %v1398_v23, %v1398_v23 }
  0x97   :  { %256 = vadd.xlane.f32.xlu1 %v199_v56  ;;  %254 = vadd.xlane.f32.xlu0 %v198_v57  ;;  %v215_v56 = vmul.f32 %v1402_v24, %v1402_v24 }
  0x9b   :  { %260 = vadd.xlane.f32.xlu1 %v201_v58  ;;  %258 = vadd.xlane.f32.xlu0 %v200_v59  ;;  %v214_v59 = vmul.f32 %v1404_v25, %v1404_v25 }
  0x9f   :  { %264 = vadd.xlane.f32.xlu1 %v203_v60  ;;  %262 = vadd.xlane.f32.xlu0 %v202_v61  ;;  %v217_v60 = vmul.f32 %v1408_v26, %v1408_v26 }
  0xa3   :  { %268 = vadd.xlane.f32.xlu1 %v205_v62  ;;  %266 = vadd.xlane.f32.xlu0 %v204_v63  ;;  %v216_v63 = vmul.f32 %v1410_v27, %v1410_v27 }
  0xa7   :  { %272 = vadd.xlane.f32.xlu1 %v207_v48  ;;  %270 = vadd.xlane.f32.xlu0 %v206_v49  ;;  %v219_v48 = vmul.f32 %v1414_v28, %v1414_v28 }
  0xab   :  { %276 = vadd.xlane.f32.xlu1 %v209_v50  ;;  %274 = vadd.xlane.f32.xlu0 %v208_v51  ;;  %v218_v51 = vmul.f32 %v1416_v29, %v1416_v29 }
  0xaf   :  { %280 = vadd.xlane.f32.xlu1 %v211_v52  ;;  %278 = vadd.xlane.f32.xlu0 %v210_v53  ;;  %v221_v52 = vmul.f32 %v1420_v30, %v1420_v30 }
  0xb3   :  { %284 = vadd.xlane.f32.xlu1 %v213_v54  ;;  %282 = vadd.xlane.f32.xlu0 %v212_v55  ;;  %v220_v55 = vmul.f32 %v1422_v31, %v1422_v31 }
  0xb4   :  { %v1524_v57 = vpop.xlane.xlu1 %98  ;;  %v1526_v58 = vpop.xlane.xlu0 %94 }
  0xb5   :  { %v1643_v27 = vmul.f32 0.0078125, %v1524_v57  ;;  %v1646_v26 = vmul.f32 0.0078125, %v1526_v58 }
  0xb7   :  { %288 = vadd.xlane.f32.xlu1 %v215_v56  ;;  %286 = vadd.xlane.f32.xlu0 %v214_v59  ;;  %v223_v56 = vmul.f32 %v1426_v32, %v1426_v32  ;;  %2725 = vst [vmem:[#allocation47_spill] sm:$0xff] %v1643_v27  ;;  %2726 = vst [vmem:[#allocation48_spill] sm:$0xff] %v1646_v26  ;;  %v1666_v57 = vmul.f32 %v1643_v27, %v1643_v27 }
  0xb8   :  { %v1532_v61 = vpop.xlane.xlu1 %100  ;;  %v1534_v62 = vpop.xlane.xlu0 %96 }
  0xb9   :  { %v1649_v25 = vmul.f32 0.0078125, %v1532_v61  ;;  %2731 = vst [vmem:[#allocation53_spill] sm:$0xff] %v1666_v57  ;;  %v1672_v61 = vmul.f32 %v1646_v26, %v1646_v26 }
  0xbb   :  { %292 = vadd.xlane.f32.xlu1 %v217_v60  ;;  %290 = vadd.xlane.f32.xlu0 %v216_v63  ;;  %v222_v63 = vmul.f32 %v1428_v33, %v1428_v33  ;;  %2727 = vst [vmem:[#allocation49_spill] sm:$0xff] %v1649_v25 }
  0xbc   :  { %v1540_v49 = vpop.xlane.xlu1 %104  ;;  %v1542_v50 = vpop.xlane.xlu0 %102 }
  0xbf   :  { %296 = vadd.xlane.f32.xlu1 %v219_v48  ;;  %294 = vadd.xlane.f32.xlu0 %v218_v51  ;;  %v225_v48 = vmul.f32 %v1432_v34, %v1432_v34 }
  0xc0   :  { %v1548_v53 = vpop.xlane.xlu1 %108  ;;  %v1550_v54 = vpop.xlane.xlu0 %106 }
  0xc3   :  { %300 = vadd.xlane.f32.xlu1 %v221_v52  ;;  %298 = vadd.xlane.f32.xlu0 %v220_v55  ;;  %v224_v52 = vmul.f32 %v1434_v35, %v1434_v35  ;;  %v227_v55 = vmul.f32 %v1438_v36, %v1438_v36 }
  0xc4   :  { %v1556_v59 = vpop.xlane.xlu1 %112  ;;  %v1558_v60 = vpop.xlane.xlu0 %110 }
  0xc5   :  { %v1695_v27 = vmul.f32 0.0078125, %v1556_v59 }
  0xc7   :  { %304 = vadd.xlane.f32.xlu1 %v223_v56  ;;  %302 = vadd.xlane.f32.xlu0 %v222_v63  ;;  %v226_v56 = vmul.f32 %v1440_v37, %v1440_v37  ;;  %v229_v63 = vmul.f32 %v1444_v38, %v1444_v38  ;;  %2734 = vst [vmem:[#allocation56_spill] sm:$0xff] %v1695_v27 }
  0xc8   :  { %v1564_v51 = vpop.xlane.xlu1 %116  ;;  %v1566_v31 = vpop.xlane.xlu0 %114 }
  0xc9   :  { %v1715_v59 = vmul.f32 0.0078125, %v1564_v51  ;;  %v1726_v1 = vmul.f32 0.0078125, %v1566_v31 }
  0xcb   :  { %308 = vadd.xlane.f32.xlu1 %v225_v48  ;;  %306 = vadd.xlane.f32.xlu0 %v224_v52  ;;  %v228_v48 = vmul.f32 %v1446_v39, %v1446_v39  ;;  %v231_v52 = vmul.f32 %v1450_v40, %v1450_v40  ;;  %2736 = vst [vmem:[#allocation58_spill] sm:$0xff] %v1715_v59  ;;  %2737 = vst [vmem:[#allocation59_spill] sm:$0xff] %v1726_v1 }
  0xcc   :  { %v1572_v32 = vpop.xlane.xlu1 %120  ;;  %v1574_v33 = vpop.xlane.xlu0 %118 }
  0xcf   :  { %312 = vadd.xlane.f32.xlu1 %v227_v55  ;;  %310 = vadd.xlane.f32.xlu0 %v226_v56  ;;  %v230_v55 = vmul.f32 %v1452_v41, %v1452_v41  ;;  %v233_v56 = vmul.f32 %v1456_v42, %v1456_v42  ;;  %v234_v42 = vmul.f32 %v1464_v45, %v1464_v45 }
  0xd0   :  { %v1580_v34 = vpop.xlane.xlu1 %124  ;;  %v1582_v35 = vpop.xlane.xlu0 %122 }
  0xd3   :  { %316 = vadd.xlane.f32.xlu1 %v229_v63  ;;  %314 = vadd.xlane.f32.xlu0 %v228_v48  ;;  %v232_v63 = vmul.f32 %v1458_v43, %v1458_v43  ;;  %v235_v48 = vmul.f32 %v1462_v44, %v1462_v44  ;;  %v236_v44 = vmul.f32 %v1470_v47, %v1470_v47 }
  0xd4   :  { %v1588_v36 = vpop.xlane.xlu1 %128  ;;  %v1590_v37 = vpop.xlane.xlu0 %126 }
  0xd5   :  { %v1775_v7 = vmul.f32 0.0078125, %v1588_v36 }
  0xd7   :  { %320 = vadd.xlane.f32.xlu1 %v231_v52  ;;  %318 = vadd.xlane.f32.xlu0 %v230_v55  ;;  %v237_v52 = vmul.f32 %v1468_v46, %v1468_v46  ;;  %2742 = vst [vmem:[#allocation64_spill] sm:$0xff] %v1775_v7 }
  0xd8   :  { %v1596_v38 = vpop.xlane.xlu1 %132  ;;  %v1598_v39 = vpop.xlane.xlu0 %130 }
  0xdb   :  { %324 = vadd.xlane.f32.xlu1 %v233_v56  ;;  %322 = vadd.xlane.f32.xlu0 %v232_v63 }
  0xdc   :  { %v1604_v40 = vpop.xlane.xlu1 %136  ;;  %v1606_v41 = vpop.xlane.xlu0 %134 }
  0xdd   :  { %v1818_v13 = vmul.f32 0.0078125, %v1606_v41 }
  0xdf   :  { %328 = vadd.xlane.f32.xlu1 %v235_v48  ;;  %326 = vadd.xlane.f32.xlu0 %v234_v42  ;;  %2747 = vst [vmem:[#allocation69_spill] sm:$0xff] %v1818_v13 }
  0xe0   :  { %v1612_v55 = vpop.xlane.xlu1 %140  ;;  %v1614_v43 = vpop.xlane.xlu0 %138 }
  0xe1   :  { %v1831_v14 = vmul.f32 0.0078125, %v1612_v55  ;;  %v1868_v55 = vmul.f32 %v1818_v13, %v1818_v13 }
  0xe3   :  { %332 = vadd.xlane.f32.xlu1 %v237_v52  ;;  %330 = vadd.xlane.f32.xlu0 %v236_v44  ;;  %2748 = vst [vmem:[#allocation70_spill] sm:$0xff] %v1831_v14 }
  0xe4   :  { %v1618_v56 = vpop.xlane.xlu1 %144  ;;  %v1620_v63 = vpop.xlane.xlu0 %142 }
  0xe8   :  { %v1622_v30 = vpop.xlane.xlu1 %148  ;;  %v1624_v45 = vpop.xlane.xlu0 %146 }
  0xec   :  { %v1626_v48 = vpop.xlane.xlu1 %152  ;;  %v1628_v46 = vpop.xlane.xlu0 %150 }
  0xf0   :  { %v1630_v42 = vpop.xlane.xlu1 %156  ;;  %v1632_v29 = vpop.xlane.xlu0 %154 }
  0xf1   :  { %2720 = vst [vmem:[#allocation42_spill] sm:$0xff] %v1630_v42  ;;  %2721 = vst [vmem:[#allocation43_spill] sm:$0xff] %v1632_v29  ;;  %v1652_v42 = vmul.f32 0.0078125, %v1534_v62  ;;  %v1675_v62 = vmul.f32 0.0078125, %v1548_v53 }
  0xf3   :  { %2732 = vst [vmem:[#allocation54_spill] sm:$0xff] %v1675_v62  ;;  %v1690_v58 = vmul.f32 %v1652_v42, %v1652_v42 }
  0xf4   :  { %v1634_v28 = vpop.xlane.xlu1 %160  ;;  %v1636_v47 = vpop.xlane.xlu0 %158 }
  0xf5   :  { %2722 = vst [vmem:[#allocation44_spill] sm:$0xff] %v1634_v28 }
  0xf8   :  { %v1638_v52 = vpop.xlane.xlu1 %164  ;;  %v1640_v44 = vpop.xlane.xlu0 %162  ;;  %v2762_v24 = vld [vmem:[#allocation43_spill] sm:$0xff] }
  0xf9   :  { %2723 = vst [vmem:[#allocation45_spill] sm:$0xff] %v1638_v52  ;;  %2724 = vst [vmem:[#allocation46_spill] sm:$0xff] %v1640_v44  ;;  %v1659_v52 = vmul.f32 0.0078125, %v1540_v49  ;;  %v1662_v44 = vmul.f32 0.0078125, %v1542_v50  ;;  %v1681_v50 = vmul.f32 %v1649_v25, %v1649_v25  ;;  %v1698_v49 = vmul.f32 0.0078125, %v1558_v60 }
  0xfa   :  { %v1721_v25 = vmul.f32 %v1675_v62, %v1675_v62  ;;  %v1738_v60 = vmul.f32 0.0078125, %v1574_v33  ;;  %v1751_v62 = vmul.f32 0.0078125, %v1580_v34  ;;  %v1770_v34 = vmul.f32 %v1726_v1, %v1726_v1 }
  0xfb   :  { %2729 = vst [vmem:[#allocation51_spill] sm:$0xff] %v1659_v52  ;;  %2730 = vst [vmem:[#allocation52_spill] sm:$0xff] %v1662_v44  ;;  %v1712_v53 = vmul.f32 %v1662_v44, %v1662_v44  ;;  %v1742_v44 = vmul.f32 %v1695_v27, %v1695_v27  ;;  %v1748_v2 = vmul.f32 %v1698_v49, %v1698_v49  ;;  %v1766_v27 = vmul.f32 0.0078125, %v1582_v35 }
  0xfc   :  { %v1654_v29 = vpop.xlane.xlu1 %168  ;;  %v1656_v28 = vpop.xlane.xlu0 %166  ;;  %2735 = vst [vmem:[#allocation57_spill] sm:$0xff] %v1698_v49  ;;  %2739 = vst [vmem:[#allocation61_spill] sm:$0xff] %v1738_v60  ;;  %v1778_v33 = vmul.f32 0.0078125, %v1590_v37  ;;  %v1788_v31 = vmul.f32 %v1738_v60, %v1738_v60  ;;  %v1797_v37 = vmul.f32 %v1751_v62, %v1751_v62  ;;  %v1802_v1 = vmul.f32 0.0078125, %v1598_v39 }
  0xfd   :  { %2728 = vst [vmem:[#allocation50_spill] sm:$0xff] %v1656_v28  ;;  %v1686_v28 = vmul.f32 0.0078125, %v1550_v54  ;;  %v1706_v54 = vmul.f32 %v1659_v52, %v1659_v52  ;;  %v1735_v52 = vmul.f32 0.0078125, %v1572_v32  ;;  %2740 = vst [vmem:[#allocation62_spill] sm:$0xff] %v1751_v62  ;;  %v1815_v60 = vmul.f32 0.0078125, %v1604_v40 }
  0xfe   :  { %2741 = vst [vmem:[#allocation63_spill] sm:$0xff] %v1766_v27  ;;  %2743 = vst [vmem:[#allocation65_spill] sm:$0xff] %v1778_v33  ;;  %v1822_v39 = vmul.f32 %v1775_v7, %v1775_v7  ;;  %v1828_v62 = vmul.f32 %v1778_v33, %v1778_v33  ;;  %v1846_v8 = vmul.f32 %v1802_v1, %v1802_v1  ;;  %v1851_v7 = vmul.f32 0.0078125, %v1618_v56 }
  0xff   :  { %2733 = vst [vmem:[#allocation55_spill] sm:$0xff] %v1686_v28  ;;  %v1730_v57 = vmul.f32 %v1686_v28, %v1686_v28  ;;  %2738 = vst [vmem:[#allocation60_spill] sm:$0xff] %v1735_v52  ;;  %v1761_v28 = vmul.f32 %v1715_v59, %v1715_v59  ;;  %v1782_v49 = vmul.f32 %v1735_v52, %v1735_v52  ;;  %v1791_v59 = vmul.f32 0.0078125, %v1596_v38 }
 0x100   :  { %v1700_v0 = vpop.xlane.xlu1 %172  ;;  %v1702_v26 = vpop.xlane.xlu0 %170  ;;  %2745 = vst [vmem:[#allocation67_spill] sm:$0xff] %v1802_v1  ;;  %v1810_v38 = vmul.f32 %v1766_v27, %v1766_v27  ;;  %2746 = vst [vmem:[#allocation68_spill] sm:$0xff] %v1815_v60  ;;  %v1842_v27 = vmul.f32 0.0078125, %v1614_v43  ;;  %v1854_v40 = vmul.f32 0.0078125, %v1620_v63  ;;  %v1862_v43 = vmul.f32 %v1815_v60, %v1815_v60 }
 0x101   :  { %2744 = vst [vmem:[#allocation66_spill] sm:$0xff] %v1791_v59  ;;  %v1837_v41 = vmul.f32 %v1791_v59, %v1791_v59  ;;  %2750 = vst [vmem:[#allocation72_spill] sm:$0xff] %v1851_v7  ;;  %v1871_v56 = vmul.f32 0.0078125, %v1622_v30  ;;  %v1877_v1 = vmul.f32 %v1831_v14, %v1831_v14  ;;  %v1882_v59 = vmul.f32 0.0078125, %v1624_v45  ;;  %v2758_v14 = vld [vmem:[#allocation42_spill] sm:$0xff]  ;;  %v2772_v45 = vld [vmem:[#allocation45_spill] sm:$0xff] }
 0x102   :  { %2749 = vst [vmem:[#allocation71_spill] sm:$0xff] %v1842_v27  ;;  %2751 = vst [vmem:[#allocation73_spill] sm:$0xff] %v1854_v40  ;;  %v1886_v36 = vmul.f32 %v1842_v27, %v1842_v27  ;;  %v1891_v60 = vmul.f32 0.0078125, %v1626_v48  ;;  %v1894_v63 = vmul.f32 0.0078125, %v1628_v46  ;;  %v1898_v13 = vmul.f32 %v1851_v7, %v1851_v7 }
 0x103   :  { %2752 = vst [vmem:[#allocation74_spill] sm:$0xff] %v1871_v56  ;;  %2753 = vst [vmem:[#allocation75_spill] sm:$0xff] %v1882_v59  ;;  %v1904_v19 = vmul.f32 %v1854_v40, %v1854_v40  ;;  %v1907_v22 = vmul.f32 0.0078125, %v2758_v14  ;;  %v1917_v23 = vmul.f32 %v1871_v56, %v1871_v56  ;;  %v1922_v21 = vmul.f32 0.0078125, %v2762_v24 }
 0x104   :  { %v1753_v51 = vpop.xlane.xlu1 %176  ;;  %v1755_v32 = vpop.xlane.xlu0 %174  ;;  %2754 = vst [vmem:[#allocation76_spill] sm:$0xff] %v1891_v60  ;;  %2755 = vst [vmem:[#allocation77_spill] sm:$0xff] %v1894_v63  ;;  %v1926_v14 = vmul.f32 %v1882_v59, %v1882_v59  ;;  %v1934_v27 = vmul.f32 0.0078125, %v1636_v47  ;;  %v1938_v40 = vmul.f32 %v1891_v60, %v1891_v60  ;;  %v1944_v56 = vmul.f32 %v1894_v63, %v1894_v63 }
 0x105   :  { %2756 = vst [vmem:[#allocation78_spill] sm:$0xff] %v1898_v13  ;;  %2757 = vst [vmem:[#allocation79_spill] sm:$0xff] %v1904_v19  ;;  %v2766_v19 = vld [vmem:[#allocation44_spill] sm:$0xff]  ;;  %v1947_v46 = vmul.f32 0.0078125, %v2772_v45  ;;  %v1953_v47 = vmul.f32 %v1907_v22, %v1907_v22  ;;  %v1962_v24 = vmul.f32 %v1922_v21, %v1922_v21  ;;  %v1977_v59 = vmul.f32 0.0078125, %v1654_v29  ;;  %v2787_v29 = vld [vmem:[#allocation50_spill] sm:$0xff] }
 0x106   :  { %2759 = vst [vmem:[#allocation42_spill] sm:$0xff] %v1907_v22  ;;  %2763 = vst [vmem:[#allocation43_spill] sm:$0xff] %v1922_v21  ;;  %v1931_v13 = vmul.f32 0.0078125, %v2766_v19  ;;  %v1994_v21 = vmul.f32 0.0078125, %v2787_v29  ;;  %v2008_v22 = vmul.f32 0.0078125, %v1702_v26  ;;  %v2023_v26 = vmul.f32 0.0078125, %v1753_v51 }
 0x107   :  { %2764 = vst [vmem:[#allocation80_spill] sm:$0xff] %v1926_v14  ;;  %2768 = vst [vmem:[#allocation81_spill] sm:$0xff] %v1934_v27 }
 0x108   :  { %v1804_v35 = vpop.xlane.xlu1 %180  ;;  %v1806_v52 = vpop.xlane.xlu0 %178  ;;  %2767 = vst [vmem:[#allocation44_spill] sm:$0xff] %v1931_v13  ;;  %2769 = vst [vmem:[#allocation82_spill] sm:$0xff] %v1938_v40  ;;  %v2777_v40 = vld [vmem:[#allocation46_spill] sm:$0xff]  ;;  %v1968_v19 = vmul.f32 %v1931_v13, %v1931_v13  ;;  %v2003_v13 = vmul.f32 %v1977_v59, %v1977_v59 }
 0x109   :  { %2771 = vst [vmem:[#allocation83_spill] sm:$0xff] %v1944_v56  ;;  %2773 = vst [vmem:[#allocation45_spill] sm:$0xff] %v1947_v46  ;;  %v1958_v14 = vmul.f32 0.0078125, %v2777_v40  ;;  %v1974_v40 = vmul.f32 %v1934_v27, %v1934_v27  ;;  %v2050_v29 = vmul.f32 0.0078125, %v1806_v52 }
 0x10a   :  { %2775 = vst [vmem:[#allocation84_spill] sm:$0xff] %v1953_v47  ;;  %2779 = vst [vmem:[#allocation85_spill] sm:$0xff] %v1962_v24  ;;  %v1997_v47 = vmul.f32 0.0078125, %v1700_v0 }
 0x10b   :  { %2778 = vst [vmem:[#allocation46_spill] sm:$0xff] %v1958_v14  ;;  %2782 = vst [vmem:[#allocation86_spill] sm:$0xff] %v1977_v59  ;;  %v1991_v20 = vmul.f32 %v1958_v14, %v1958_v14  ;;  %v2029_v59 = vmul.f32 %v2008_v22, %v2008_v22 }
 0x10c   :  { %v1856_v33 = vpop.xlane.xlu1 %184  ;;  %v1858_v17 = vpop.xlane.xlu0 %182  ;;  %2788 = vst [vmem:[#allocation50_spill] sm:$0xff] %v1994_v21  ;;  %2789 = vst [vmem:[#allocation89_spill] sm:$0xff] %v1997_v47 }
 0x10d   :  { %2786 = vst [vmem:[#allocation88_spill] sm:$0xff] %v1991_v20  ;;  %2792 = vst [vmem:[#allocation90_spill] sm:$0xff] %v2008_v22 }
 0x10e   :  { %2796 = vst [vmem:[#allocation91_spill] sm:$0xff] %v2023_v26  ;;  %2801 = vst [vmem:[#allocation94_spill] sm:$0xff] %v2050_v29 }
 0x110   :  { %v1909_v30 = vpop.xlane.xlu1 %188  ;;  %v1911_v48 = vpop.xlane.xlu0 %186 }
 0x114   :  { %v241_v7 = vpop.xlane.xlu1 %240  ;;  %v239_v60 = vpop.xlane.xlu0 %238 }
 0x115   :  { %v383_v18 = vmul.f32 0.0078125, %v241_v7  ;;  %v382_v63 = vmul.f32 0.0078125, %v239_v60  ;;  %v1983_v7 = vmul.f32 %v1947_v46, %v1947_v46 }
 0x117   :  { %2784 = vst [vmem:[#allocation87_spill] sm:$0xff] %v1983_v7  ;;  %v479_v60 = vsub.f32 %v383_v18, %v1690_v58  ;;  %v478_v56 = vsub.f32 %v382_v63, %v1672_v61  ;;  %v2020_v61 = vmul.f32 %v1997_v47, %v1997_v47 }
 0x118   :  { %v245_v27 = vpop.xlane.xlu1 %244  ;;  %v243_v24 = vpop.xlane.xlu0 %242 }
 0x119   :  { %v527_v45 = vmax.f32 %v479_v60, 0.0  ;;  %v526_v7 = vmax.f32 %v478_v56, 0.0  ;;  %v385_v18 = vmul.f32 0.0078125, %v245_v27  ;;  %v384_v58 = vmul.f32 0.0078125, %v243_v24  ;;  %v2793_v56 = vld [vmem:[#allocation53_spill] sm:$0xff] }
 0x11a   :  { %v2014_v24 = vmul.f32 %v1994_v21, %v1994_v21  ;;  %2795 = vst [vmem:[#allocation53_spill] sm:$0xff] %v2020_v61 }
 0x11b   :  { %v575_v0 = vadd.f32 1e-12, %v527_v45  ;;  %v574_v20 = vadd.f32 1e-12, %v526_v7  ;;  %v481_v60 = vsub.f32 %v385_v18, %v1681_v50  ;;  %v480_v27 = vsub.f32 %v384_v58, %v2793_v56 }
 0x11c   :  { %v249_v45 = vpop.xlane.xlu1 %248  ;;  %v247_v7 = vpop.xlane.xlu0 %246 }
 0x11d   :  { %1093 = vrsqrt.f32 %v575_v0  ;;  %v529_v50 = vmax.f32 %v481_v60, 0.0  ;;  %v528_v18 = vmax.f32 %v480_v27, 0.0  ;;  %v387_v58 = vmul.f32 0.0078125, %v249_v45  ;;  %v2044_v45 = vld [vmem:[#allocation5 + $0x8] sm:$0xff] }
 0x11e   :  { %1095 = vrsqrt.f32 %v574_v20  ;;  %v386_v14 = vmul.f32 0.0078125, %v247_v7  ;;  %v2036_v0 = vmul.f32 %v2023_v26, %v2023_v26  ;;  %v2039_v60 = vmul.f32 0.0078125, %v1755_v32 }
 0x11f   :  { %v577_v51 = vadd.f32 1e-12, %v529_v50  ;;  %v576_v46 = vadd.f32 1e-12, %v528_v18  ;;  %v483_v61 = vsub.f32 %v387_v58, %v1706_v54  ;;  %v2042_v27 = vmul.f32 0.0078125, %v1804_v35  ;;  %v2047_v50 = vld [vmem:[#allocation5] sm:$0xff] }
 0x120   :  { %2799 = vst [vmem:[#allocation92_spill] sm:$0xff] %v2039_v60  ;;  %v482_v20 = vsub.f32 %v386_v14, %v1712_v53  ;;  %v253_v7 = vpop.xlane.xlu1 %252  ;;  %v251_v63 = vpop.xlane.xlu0 %250  ;;  %v2053_v32 = vmul.f32 0.0078125, %v1856_v33  ;;  %vm925_vm0 = vcmp.ge.u32.totalorder %v2044_v45, 429496729  ;;  %v2069_v33 = vmul.f32 0.0078125, %v1858_v17 }
 0x121   :  { %2800 = vst [vmem:[#allocation93_spill] sm:$0xff] %v2042_v27  ;;  %1097 = vrsqrt.f32 %v577_v51  ;;  %v531_v54 = vmax.f32 %v483_v61, 0.0  ;;  %v389_v18 = vmul.f32 0.0078125, %v253_v7  ;;  %v388_v58 = vmul.f32 0.0078125, %v251_v63  ;;  %v2074_v7 = vld [vmem:[#allocation5 + $0x10] sm:$0xff] }
 0x122   :  { %2802 = vst [vmem:[#allocation95_spill] sm:$0xff] %v2053_v32  ;;  %1099 = vrsqrt.f32 %v576_v46  ;;  %v530_v35 = vmax.f32 %v482_v20, 0.0  ;;  %v2062_v63 = vmul.f32 %v2039_v60, %v2039_v60  ;;  %v2066_v52 = vmul.f32 %v2042_v27, %v2042_v27  ;;  %2804 = vst [vmem:[#allocation96_spill] sm:$0xff] %v2069_v33  ;;  %v2072_v46 = vld [vmem:[#allocation5 + $0x18] sm:$0xff] }
 0x123   :  { %v579_v53 = vadd.f32 1e-12, %v531_v54  ;;  %v485_v14 = vsub.f32 %v389_v18, %v1721_v25  ;;  %v484_v61 = vsub.f32 %v388_v58, %v1730_v57  ;;  %vm924_vm1 = vcmp.ge.u32.totalorder %v2047_v50, 429496729 }
 0x124   :  { %v578_v51 = vadd.f32 1e-12, %v530_v35  ;;  %v257_v20 = vpop.xlane.xlu1 %256  ;;  %v255_v25 = vpop.xlane.xlu0 %254  ;;  %v2078_v58 = vmul.f32 %v2050_v29, %v2050_v29  ;;  %v2082_v17 = vmul.f32 %v2053_v32, %v2053_v32  ;;  %v2087_v35 = vld [vmem:[%s2591_s1] ss:$0 sm:$0xff]  ;;  %vm927_vm2 = vcmp.ge.u32.totalorder %v2072_v46, 429496729 }
 0x125   :  { %1101 = vrsqrt.f32 %v579_v53  ;;  %v533_v57 = vmax.f32 %v485_v14, 0.0  ;;  %v532_v54 = vmax.f32 %v484_v61, 0.0  ;;  %v391_v18 = vmul.f32 0.0078125, %v257_v20 }
 0x126   :  { %1103 = vrsqrt.f32 %v578_v51  ;;  %v390_v21 = vmul.f32 0.0078125, %v255_v25  ;;  %v2090_v53 = vmul.f32 0.0078125, %v1909_v30  ;;  %v2096_v32 = vmul.f32 %v2069_v33, %v2069_v33  ;;  %v2105_v30 = vld [vmem:[#allocation5 + $0x28] sm:$0xff] }
 0x127   :  { %v1094_v27 = vpop.eup %1093  ;;  %v581_v14 = vadd.f32 1e-12, %v533_v57  ;;  %v580_v61 = vadd.f32 1e-12, %v532_v54  ;;  %v487_v20 = vsub.f32 %v391_v18, %v1742_v44  ;;  %v2099_v26 = vmul.f32 0.0078125, %v1911_v48  ;;  %v2809_v33 = vld [vmem:[#allocation12_spill] sm:$0xff] }
 0x128   :  { %2805 = vst [vmem:[#allocation97_spill] sm:$0xff] %v2090_v53  ;;  %v1096_v29 = vpop.eup %1095  ;;  %2806 = vst [vmem:[#allocation98_spill] sm:$0xff] %v2096_v32  ;;  %v2808_v51 = vsub.f32 %v1338_v3, %v1652_v42  ;;  %vm926_vm3 = vcmp.ge.u32.totalorder %v2074_v7, 429496729  ;;  %v486_v57 = vsub.f32 %v390_v21, %v1748_v2  ;;  %v261_v54 = vpop.xlane.xlu1 %260  ;;  %v2111_v18 = vld [vmem:[%s2592_s2] ss:$0 sm:$0xff]  ;;  %v2121_v32 = vmul.f32 %v2090_v53, %v2090_v53 }
 0x129   :  { %2807 = vst [vmem:[#allocation99_spill] sm:$0xff] %v2099_v26  ;;  %v259_v44 = vpop.xlane.xlu0 %258  ;;  %v2810_v48 = vld [vmem:[#allocation48_spill] sm:$0xff]  ;;  %v2116_v26 = vld [vmem:[#allocation5 + $0x20] sm:$0xff]  ;;  %1105 = vrsqrt.f32 %v581_v14  ;;  %v535_v3 = vmax.f32 %v487_v20, 0.0  ;;  %v393_v42 = vmul.f32 0.0078125, %v261_v54  ;;  %v2813_v20 = vld [vmem:[#allocation13_spill] sm:$0xff] }
 0x12a   :  { %v719_v25 = vmul.f32 %v1094_v27, %v2808_v51  ;;  %v2811_v22 = vsub.f32 %v2809_v33, %v2810_v48  ;;  %1107 = vrsqrt.f32 %v580_v61  ;;  %v534_v2 = vmax.f32 %v486_v57, 0.0  ;;  %2812 = vst [vmem:[#allocation12_spill] sm:$0xff] %v2121_v32  ;;  %v2131_v54 = vld [vmem:[#allocation5 + $0x38] sm:$0xff]  ;;  %v2816_v32 = vld [vmem:[#allocation11_spill] sm:$0xff] }
 0x12b   :  { %v392_v21 = vmul.f32 0.0078125, %v259_v44  ;;  %v1098_v51 = vpop.eup %1097  ;;  %vm929_vm4 = vcmp.ge.u32.totalorder %v2105_v30, 429496729  ;;  %vm928_vm5 = vcmp.ge.u32.totalorder %v2116_v26, 429496729 }
 0x12c   :  { %v718_v60 = vmul.f32 %v1096_v29, %v2811_v22  ;;  %v774_v27 = vmul.f32 %v2087_v35, %v719_v25  ;;  %v583_v22 = vadd.f32 1e-12, %v535_v3  ;;  %v489_v29 = vsub.f32 %v393_v42, %v1761_v28  ;;  %v1100_v33 = vpop.eup %1099  ;;  %v2814_v25 = vld [vmem:[#allocation49_spill] sm:$0xff]  ;;  %v2817_v28 = vld [vmem:[#allocation47_spill] sm:$0xff] }
 0x12d   :  { %v2815_v61 = vsub.f32 %v2813_v20, %v2814_v25  ;;  %v582_v44 = vadd.f32 1e-12, %v534_v2  ;;  %v488_v48 = vsub.f32 %v392_v21, %v1770_v34  ;;  %v263_v53 = vpop.xlane.xlu0 %262  ;;  %v2818_v42 = vsub.f32 %v2816_v32, %v2817_v28 }
 0x12e   :  { %v773_v47 = vmul.f32 %v2087_v35, %v718_v60  ;;  %v829_v14 = vadd.f32 %v2111_v18, %v774_v27  ;;  %v265_v60 = vpop.xlane.xlu1 %264  ;;  %v2138_v27 = vld [vmem:[#allocation5 + $0x30] sm:$0xff]  ;;  %1109 = vrsqrt.f32 %v583_v22  ;;  %v537_v20 = vmax.f32 %v489_v29, 0.0  ;;  %v2819_v29 = vld [vmem:[#allocation51_spill] sm:$0xff] }
 0x12f   :  { %v721_v57 = vmul.f32 %v1098_v51, %v2815_v61  ;;  %v720_v56 = vmul.f32 %v1100_v33, %v2818_v42  ;;  %1111 = vrsqrt.f32 %v582_v44  ;;  %v536_v2 = vmax.f32 %v488_v48, 0.0  ;;  %v1102_v34 = vpop.eup %1101 }
 0x130   :  { %v828_v3 = vadd.f32 %v2111_v18, %v773_v47  ;;  %v973_v51 = vsel %vm925_vm0, %v829_v14, 0.0  ;;  %vm931_vm6 = vcmp.ge.u32.totalorder %v2131_v54, 429496729  ;;  %v585_v32 = vadd.f32 1e-12, %v537_v20  ;;  %v1104_v22 = vpop.eup %1103  ;;  %v2158_v20 = vld [vmem:[#allocation5 + $0x40] sm:$0xff] }
 0x131   :  { %v776_v25 = vmul.f32 %v2087_v35, %v721_v57  ;;  %1021 = vst [vmem:[#allocation7 + $0x8] sm:$0xff] %v973_v51  ;;  %v775_v21 = vmul.f32 %v2087_v35, %v720_v56  ;;  %v395_v33 = vmul.f32 0.0078125, %v265_v60  ;;  %v2820_v14 = vsub.f32 %v1342_v4, %v2819_v29  ;;  %v2152_v57 = vld [vmem:[#allocation5 + $0x48] sm:$0xff]  ;;  %v267_v56 = vpop.xlane.xlu0 %266 }
 0x132   :  { %v972_v47 = vsel %vm924_vm1, %v828_v3, 0.0  ;;  %vm930_vm7 = vcmp.ge.u32.totalorder %v2138_v27, 429496729  ;;  %v584_v50 = vadd.f32 1e-12, %v536_v2  ;;  %v394_v44 = vmul.f32 0.0078125, %v263_v53  ;;  %v269_v48 = vpop.xlane.xlu1 %268 }
 0x133   :  { %1020 = vst [vmem:[#allocation7] sm:$0xff] %v972_v47  ;;  %v831_v45 = vadd.f32 %v2111_v18, %v776_v25  ;;  %v723_v61 = vmul.f32 %v1102_v34, %v2820_v14  ;;  %v830_v3 = vadd.f32 %v2111_v18, %v775_v21  ;;  %v2821_v60 = vld [vmem:[#allocation52_spill] sm:$0xff]  ;;  %1113 = vrsqrt.f32 %v585_v32  ;;  %v1106_v2 = vpop.eup %1105  ;;  %v2823_v32 = vld [vmem:[#allocation54_spill] sm:$0xff] }
 0x134   :  { %v2822_v28 = vsub.f32 %v1344_v5, %v2821_v60  ;;  %v491_v4 = vsub.f32 %v395_v33, %v1782_v49  ;;  %1115 = vrsqrt.f32 %v584_v50  ;;  %v490_v53 = vsub.f32 %v394_v44, %v1788_v31  ;;  %v1108_v49 = vpop.eup %1107  ;;  %v2174_v31 = vld [vmem:[#allocation5 + $0x58] sm:$0xff]  ;;  %v2826_v44 = vld [vmem:[#allocation55_spill] sm:$0xff]  ;;  %v2180_v60 = vld [vmem:[#allocation5 + $0x50] sm:$0xff] }
 0x135   :  { %v975_v51 = vsel %vm927_vm2, %v831_v45, 0.0  ;;  %v778_v25 = vmul.f32 %v2087_v35, %v723_v61  ;;  %v974_v34 = vsel %vm926_vm3, %v830_v3, 0.0  ;;  %vm933_vm8 = vcmp.ge.u32.totalorder %v2152_v57, 429496729  ;;  %v271_v14 = vpop.xlane.xlu0 %270  ;;  %v2825_v50 = vld [vmem:[#allocation14_spill] sm:$0xff] }
 0x136   :  { %v722_v42 = vmul.f32 %v1104_v22, %v2822_v28  ;;  %1023 = vst [vmem:[#allocation7 + $0x18] sm:$0xff] %v975_v51  ;;  %v539_v47 = vmax.f32 %v491_v4, 0.0  ;;  %v397_v21 = vmul.f32 0.0078125, %v269_v48  ;;  %1022 = vst [vmem:[#allocation7 + $0x10] sm:$0xff] %v974_v34  ;;  %v2824_v33 = vsub.f32 %v1348_v6, %v2823_v32  ;;  %v273_v29 = vpop.xlane.xlu1 %272 }
 0x137   :  { %v833_v46 = vadd.f32 %v2111_v18, %v778_v25  ;;  %vm932_vm9 = vcmp.ge.u32.totalorder %v2158_v20, 429496729  ;;  %v538_v7 = vmax.f32 %v490_v53, 0.0  ;;  %v396_v45 = vmul.f32 0.0078125, %v267_v56 }
 0x138   :  { %v777_v5 = vmul.f32 %v2087_v35, %v722_v42  ;;  %v725_v22 = vmul.f32 %v1106_v2, %v2824_v33  ;;  %v2827_v48 = vsub.f32 %v2825_v50, %v2826_v44  ;;  %v587_v28 = vadd.f32 1e-12, %v539_v47  ;;  %v1110_v25 = vpop.eup %1109  ;;  %v2829_v47 = vld [vmem:[#allocation56_spill] sm:$0xff]  ;;  %v2831_v33 = vld [vmem:[#allocation57_spill] sm:$0xff] }
 0x139   :  { %v493_v6 = vsub.f32 %v397_v21, %v1797_v37  ;;  %v977_v42 = vsel %vm929_vm4, %v833_v46, 0.0  ;;  %v586_v51 = vadd.f32 1e-12, %v538_v7  ;;  %v492_v56 = vsub.f32 %v396_v45, %v1810_v38  ;;  %v1112_v37 = vpop.eup %1111  ;;  %v275_v46 = vpop.xlane.xlu0 %274 }
 0x13a   :  { %v832_v61 = vadd.f32 %v2111_v18, %v777_v5  ;;  %v724_v3 = vmul.f32 %v1108_v49, %v2827_v48  ;;  %v780_v4 = vmul.f32 %v2087_v35, %v725_v22  ;;  %1025 = vst [vmem:[#allocation7 + $0x28] sm:$0xff] %v977_v42  ;;  %vm935_vm10 = vcmp.ge.u32.totalorder %v2174_v31, 429496729  ;;  %v2828_v5 = vld [vmem:[#allocation15_spill] sm:$0xff]  ;;  %v277_v26 = vpop.xlane.xlu1 %276  ;;  %v2203_v48 = vld [vmem:[#allocation5 + $0x68] sm:$0xff] }
 0x13b   :  { %1117 = vrsqrt.f32 %v587_v28  ;;  %v541_v34 = vmax.f32 %v493_v6, 0.0  ;;  %v2830_v21 = vsub.f32 %v2828_v5, %v2829_v47  ;;  %vm934_vm11 = vcmp.ge.u32.totalorder %v2180_v60, 429496729 }
 0x13c   :  { %v976_v53 = vsel %vm928_vm5, %v832_v61, 0.0  ;;  %v779_v2 = vmul.f32 %v2087_v35, %v724_v3  ;;  %v835_v30 = vadd.f32 %v2111_v18, %v780_v4  ;;  %1119 = vrsqrt.f32 %v586_v51 }
 0x13d   :  { %1024 = vst [vmem:[#allocation7 + $0x20] sm:$0xff] %v976_v53  ;;  %v727_v49 = vmul.f32 %v1110_v25, %v2830_v21  ;;  %v540_v38 = vmax.f32 %v492_v56, 0.0  ;;  %v2832_v22 = vsub.f32 %v1356_v9, %v2831_v33  ;;  %v589_v45 = vadd.f32 1e-12, %v541_v34  ;;  %v1114_v6 = vpop.eup %1113  ;;  %v2208_v9 = vld [vmem:[#allocation5 + $0x60] sm:$0xff]  ;;  %v2833_v56 = vld [vmem:[#allocation58_spill] sm:$0xff] }
 0x13e   :  { %v834_v32 = vadd.f32 %v2111_v18, %v779_v2  ;;  %v399_v61 = vmul.f32 0.0078125, %v273_v29  ;;  %v979_v50 = vsel %vm931_vm6, %v835_v30, 0.0  ;;  %v398_v28 = vmul.f32 0.0078125, %v271_v14  ;;  %v1116_v54 = vpop.eup %1115  ;;  %v281_v27 = vpop.xlane.xlu1 %280  ;;  %v2230_v33 = vld [vmem:[#allocation5 + $0x70] sm:$0xff] }
 0x13f   :  { %v726_v7 = vmul.f32 %v1112_v37, %v2832_v22  ;;  %v782_v44 = vmul.f32 %v2087_v35, %v727_v49  ;;  %v588_v3 = vadd.f32 1e-12, %v540_v38  ;;  %1027 = vst [vmem:[#allocation7 + $0x38] sm:$0xff] %v979_v50  ;;  %1121 = vrsqrt.f32 %v589_v45  ;;  %v279_v2 = vpop.xlane.xlu0 %278  ;;  %v2835_v37 = vld [vmem:[#allocation59_spill] sm:$0xff] }
 0x140   :  { %v978_v42 = vsel %vm930_vm7, %v834_v32, 0.0  ;;  %v495_v29 = vsub.f32 %v399_v61, %v1822_v39  ;;  %v2834_v25 = vsub.f32 %v1360_v10, %v2833_v56  ;;  %v494_v53 = vsub.f32 %v398_v28, %v1828_v62  ;;  %v2225_v62 = vld [vmem:[#allocation5 + $0x78] sm:$0xff]  ;;  %v2840_v56 = vld [vmem:[#allocation61_spill] sm:$0xff] }
 0x141   :  { %v781_v4 = vmul.f32 %v2087_v35, %v726_v7  ;;  %1026 = vst [vmem:[#allocation7 + $0x30] sm:$0xff] %v978_v42  ;;  %v837_v51 = vadd.f32 %v2111_v18, %v782_v44  ;;  %1123 = vrsqrt.f32 %v588_v3  ;;  %v2836_v30 = vsub.f32 %v1362_v11, %v2835_v37  ;;  %v2837_v42 = vld [vmem:[#allocation60_spill] sm:$0xff] }
 0x142   :  { %v729_v14 = vmul.f32 %v1114_v6, %v2834_v25  ;;  %vm937_vm12 = vcmp.ge.u32.totalorder %v2203_v48, 429496729  ;;  %v543_v39 = vmax.f32 %v495_v29, 0.0  ;;  %v401_v47 = vmul.f32 0.0078125, %v277_v26  ;;  %v285_v50 = vpop.xlane.xlu1 %284 }
 0x143   :  { %v836_v34 = vadd.f32 %v2111_v18, %v781_v4  ;;  %v728_v5 = vmul.f32 %v1116_v54, %v2836_v30  ;;  %v981_v21 = vsel %vm933_vm8, %v837_v51, 0.0  ;;  %vm936_vm13 = vcmp.ge.u32.totalorder %v2208_v9, 429496729  ;;  %v2839_v51 = vld [vmem:[#allocation16_spill] sm:$0xff] }
 0x144   :  { %v784_v10 = vmul.f32 %v2087_v35, %v729_v14  ;;  %v542_v49 = vmax.f32 %v494_v53, 0.0  ;;  %v400_v38 = vmul.f32 0.0078125, %v275_v46  ;;  %1029 = vst [vmem:[#allocation7 + $0x48] sm:$0xff] %v981_v21  ;;  %v591_v26 = vadd.f32 1e-12, %v543_v39  ;;  %v283_v46 = vpop.xlane.xlu0 %282  ;;  %v2254_v39 = vld [vmem:[#allocation5 + $0x80] sm:$0xff] }
 0x145   :  { %v980_v11 = vsel %vm932_vm9, %v836_v34, 0.0  ;;  %v783_v32 = vmul.f32 %v2087_v35, %v728_v5  ;;  %v497_v57 = vsub.f32 %v401_v47, %v1837_v41  ;;  %v403_v61 = vmul.f32 0.0078125, %v281_v27  ;;  %v1118_v44 = vpop.eup %1117 }
 0x146   :  { %1028 = vst [vmem:[#allocation7 + $0x40] sm:$0xff] %v980_v11  ;;  %v839_v22 = vadd.f32 %v2111_v18, %v784_v10  ;;  %v590_v7 = vadd.f32 1e-12, %v542_v49  ;;  %v496_v45 = vsub.f32 %v400_v38, %v1846_v8  ;;  %vm939_vm14 = vcmp.ge.u32.totalorder %v2225_v62, 429496729  ;;  %v1120_v6 = vpop.eup %1119  ;;  %v289_v30 = vpop.xlane.xlu1 %288  ;;  %v2842_v38 = vld [vmem:[#allocation17_spill] sm:$0xff] }
 0x147   :  { %v838_v20 = vadd.f32 %v2111_v18, %v783_v32  ;;  %1125 = vrsqrt.f32 %v591_v26  ;;  %v545_v3 = vmax.f32 %v497_v57, 0.0  ;;  %v402_v28 = vmul.f32 0.0078125, %v279_v2  ;;  %v2843_v11 = vld [vmem:[#allocation62_spill] sm:$0xff] }
 0x148   :  { %v983_v41 = vsel %vm935_vm10, %v839_v22, 0.0  ;;  %v2838_v4 = vsub.f32 %v1366_v12, %v2837_v42  ;;  %vm938_vm15 = vcmp.ge.u32.totalorder %v2230_v33, 429496729  ;;  %1127 = vrsqrt.f32 %v590_v7  ;;  %v2250_v12 = vld [vmem:[#allocation5 + $0x88] sm:$0xff]  ;;  %v287_v10 = vpop.xlane.xlu0 %286  ;;  %v2845_v22 = vld [vmem:[#allocation63_spill] sm:$0xff] }
 0x149   :  { %v544_v8 = vmax.f32 %v496_v45, 0.0  ;;  %1031 = vst [vmem:[#allocation7 + $0x58] sm:$0xff] %v983_v41  ;;  %v982_v54 = vsel %vm934_vm11, %v838_v20, 0.0  ;;  %v2841_v25 = vsub.f32 %v2839_v51, %v2840_v56  ;;  %v593_v53 = vadd.f32 1e-12, %v545_v3  ;;  %v1122_v5 = vpop.eup %1121  ;;  %v2270_v20 = vld [vmem:[#allocation5 + $0x98] sm:$0xff] }
 0x14a   :  { %v731_v29 = vmul.f32 %v1118_v44, %v2838_v4  ;;  %v499_v31 = vsub.f32 %v403_v61, %v1862_v43  ;;  %1030 = vst [vmem:[#allocation7 + $0x50] sm:$0xff] %v982_v54  ;;  %v498_v34 = vsub.f32 %v402_v28, %v1868_v55  ;;  %v405_v37 = vmul.f32 0.0078125, %v285_v50 }
 0x14b   :  { %v730_v14 = vmul.f32 %v1120_v6, %v2841_v25  ;;  %v592_v2 = vadd.f32 1e-12, %v544_v8  ;;  %1129 = vrsqrt.f32 %v593_v53  ;;  %v404_v21 = vmul.f32 0.0078125, %v283_v46  ;;  %v1124_v43 = vpop.eup %1123  ;;  %v293_v6 = vpop.xlane.xlu1 %292  ;;  %v2847_v53 = vld [vmem:[#allocation64_spill] sm:$0xff] }
 0x14c   :  { %v786_v27 = vmul.f32 %v2087_v35, %v731_v29  ;;  %v547_v47 = vmax.f32 %v499_v31, 0.0  ;;  %v2844_v32 = vsub.f32 %v2842_v38, %v2843_v11  ;;  %v546_v55 = vmax.f32 %v498_v34, 0.0  ;;  %v291_v42 = vpop.xlane.xlu0 %290 }
 0x14d   :  { %v785_v60 = vmul.f32 %v2087_v35, %v730_v14  ;;  %1131 = vrsqrt.f32 %v592_v2  ;;  %v2846_v7 = vsub.f32 %v1374_v15, %v2845_v22  ;;  %vm941_vm0 = vcmp.ge.u32.totalorder %v2250_v12, 429496729  ;;  %v2287_v2 = vld [vmem:[#allocation5 + $0xa8] sm:$0xff] }
 0x14e   :  { %v841_v49 = vadd.f32 %v2111_v18, %v786_v27  ;;  %v733_v26 = vmul.f32 %v1122_v5, %v2844_v32  ;;  %v595_v61 = vadd.f32 1e-12, %v547_v47  ;;  %v501_v50 = vsub.f32 %v405_v37, %v1877_v1  ;;  %v2276_v1 = vld [vmem:[#allocation5 + $0x90] sm:$0xff]  ;;  %v2849_v37 = vld [vmem:[#allocation78_spill] sm:$0xff] }
 0x14f   :  { %v840_v57 = vadd.f32 %v2111_v18, %v785_v60  ;;  %v732_v45 = vmul.f32 %v1124_v43, %v2846_v7  ;;  %vm940_vm1 = vcmp.ge.u32.totalorder %v2254_v39, 429496729  ;;  %v594_v3 = vadd.f32 1e-12, %v546_v55  ;;  %v297_v5 = vpop.xlane.xlu1 %296  ;;  %v2850_v47 = vld [vmem:[#allocation18_spill] sm:$0xff]  ;;  %v2295_v43 = vld [vmem:[#allocation5 + $0xa0] sm:$0xff] }
 0x150   :  { %v985_v46 = vsel %vm937_vm12, %v841_v49, 0.0  ;;  %v788_v44 = vmul.f32 %v2087_v35, %v733_v26  ;;  %v500_v28 = vsub.f32 %v404_v21, %v1886_v36  ;;  %1133 = vrsqrt.f32 %v595_v61  ;;  %v2851_v21 = vld [vmem:[#allocation65_spill] sm:$0xff]  ;;  %v295_v38 = vpop.xlane.xlu0 %294 }
 0x151   :  { %1033 = vst [vmem:[#allocation7 + $0x68] sm:$0xff] %v985_v46  ;;  %v984_v15 = vsel %vm936_vm13, %v840_v57, 0.0  ;;  %v787_v41 = vmul.f32 %v2087_v35, %v732_v45  ;;  %v549_v48 = vmax.f32 %v501_v50, 0.0  ;;  %1135 = vrsqrt.f32 %v594_v3  ;;  %v1126_v54 = vpop.eup %1125  ;;  %v2854_v50 = vld [vmem:[#allocation19_spill] sm:$0xff]  ;;  %v2855_v46 = vld [vmem:[#allocation66_spill] sm:$0xff] }
 0x152   :  { %1032 = vst [vmem:[#allocation7 + $0x60] sm:$0xff] %v984_v15  ;;  %v843_v4 = vadd.f32 %v2111_v18, %v788_v44  ;;  %v548_v29 = vmax.f32 %v500_v28, 0.0  ;;  %v407_v8 = vmul.f32 0.0078125, %v289_v30  ;;  %vm943_vm2 = vcmp.ge.u32.totalorder %v2270_v20, 429496729  ;;  %v1128_v25 = vpop.eup %1127  ;;  %v2307_v28 = vld [vmem:[#allocation5 + $0xb8] sm:$0xff] }
 0x153   :  { %v842_v36 = vadd.f32 %v2111_v18, %v787_v41  ;;  %v597_v9 = vadd.f32 1e-12, %v549_v48  ;;  %v406_v51 = vmul.f32 0.0078125, %v287_v10  ;;  %v409_v56 = vmul.f32 0.0078125, %v293_v6  ;;  %v301_v15 = vpop.xlane.xlu1 %300  ;;  %v2857_v48 = vld [vmem:[#allocation20_spill] sm:$0xff] }
 0x154   :  { %v987_v14 = vsel %vm939_vm14, %v843_v4, 0.0  ;;  %v2848_v31 = vsub.f32 %v1378_v16, %v2847_v53  ;;  %vm942_vm3 = vcmp.ge.u32.totalorder %v2276_v1, 429496729  ;;  %v596_v34 = vadd.f32 1e-12, %v548_v29  ;;  %v2853_v16 = vld [vmem:[#allocation79_spill] sm:$0xff] }
 0x155   :  { %v503_v30 = vsub.f32 %v407_v8, %v2849_v37  ;;  %1035 = vst [vmem:[#allocation7 + $0x78] sm:$0xff] %v987_v14  ;;  %v986_v60 = vsel %vm938_vm15, %v842_v36, 0.0  ;;  %v2852_v62 = vsub.f32 %v2850_v47, %v2851_v21  ;;  %1137 = vrsqrt.f32 %v597_v9  ;;  %v1130_v55 = vpop.eup %1129  ;;  %v2858_v4 = vld [vmem:[#allocation67_spill] sm:$0xff]  ;;  %v2313_v8 = vld [vmem:[#allocation5 + $0xb0] sm:$0xff]  ;;  %v2860_v36 = vld [vmem:[#allocation80_spill] sm:$0xff] }
 0x156   :  { %v735_v27 = vmul.f32 %v1126_v54, %v2848_v31  ;;  %v502_v49 = vsub.f32 %v406_v51, %v2853_v16  ;;  %1034 = vst [vmem:[#allocation7 + $0x70] sm:$0xff] %v986_v60  ;;  %1139 = vrsqrt.f32 %v596_v34  ;;  %v505_v26 = vsub.f32 %v409_v56, %v1917_v23  ;;  %v299_v51 = vpop.xlane.xlu0 %298  ;;  %v2864_v21 = vld [vmem:[#allocation82_spill] sm:$0xff]  ;;  %v2872_v1 = vld [vmem:[#allocation84_spill] sm:$0xff] }
 0x157   :  { %v734_v10 = vmul.f32 %v1128_v25, %v2852_v62  ;;  %v551_v32 = vmax.f32 %v503_v30, 0.0  ;;  %vm945_vm4 = vcmp.ge.u32.totalorder %v2287_v2, 429496729  ;;  %v408_v22 = vmul.f32 0.0078125, %v291_v42  ;;  %v1132_v45 = vpop.eup %1131  ;;  %v2861_v30 = vld [vmem:[#allocation21_spill] sm:$0xff]  ;;  %v305_v62 = vpop.xlane.xlu1 %304  ;;  %v2865_v16 = vld [vmem:[#allocation22_spill] sm:$0xff] }
 0x158   :  { %v790_v11 = vmul.f32 %v2087_v35, %v735_v27  ;;  %v550_v57 = vmax.f32 %v502_v49, 0.0  ;;  %v411_v7 = vmul.f32 0.0078125, %v297_v5  ;;  %v2856_v44 = vsub.f32 %v2854_v50, %v2855_v46  ;;  %v2862_v5 = vld [vmem:[#allocation68_spill] sm:$0xff]  ;;  %v2866_v49 = vld [vmem:[#allocation69_spill] sm:$0xff] }
 0x159   :  { %v789_v33 = vmul.f32 %v2087_v35, %v734_v10  ;;  %vm944_vm5 = vcmp.ge.u32.totalorder %v2295_v43, 429496729  ;;  %v599_v23 = vadd.f32 1e-12, %v551_v32  ;;  %v553_v6 = vmax.f32 %v505_v26, 0.0  ;;  %v2333_v26 = vld [vmem:[#allocation5 + $0xc8] sm:$0xff] }
 0x15a   :  { %v845_v61 = vadd.f32 %v2111_v18, %v790_v11  ;;  %v737_v3 = vmul.f32 %v1130_v55, %v2856_v44  ;;  %v2859_v42 = vsub.f32 %v2857_v48, %v2858_v4  ;;  %v598_v54 = vadd.f32 1e-12, %v550_v57  ;;  %v1134_v53 = vpop.eup %1133  ;;  %v303_v57 = vpop.xlane.xlu0 %302  ;;  %v2869_v48 = vld [vmem:[#allocation23_spill] sm:$0xff]  ;;  %v2870_v4 = vld [vmem:[#allocation70_spill] sm:$0xff] }
 0x15b   :  { %v844_v41 = vadd.f32 %v2111_v18, %v789_v33  ;;  %v504_v9 = vsub.f32 %v408_v22, %v2860_v36  ;;  %1141 = vrsqrt.f32 %v599_v23  ;;  %v601_v14 = vadd.f32 1e-12, %v553_v6  ;;  %v1136_v37 = vpop.eup %1135  ;;  %v2343_v23 = vld [vmem:[#allocation5 + $0xd8] sm:$0xff]  ;;  %v309_v36 = vpop.xlane.xlu1 %308 }
 0x15c   :  { %v736_v29 = vmul.f32 %v1132_v45, %v2859_v42  ;;  %v989_v56 = vsel %vm941_vm0, %v845_v61, 0.0  ;;  %v792_v25 = vmul.f32 %v2087_v35, %v737_v3  ;;  %vm947_vm6 = vcmp.ge.u32.totalorder %v2307_v28, 429496729  ;;  %v2338_v61 = vld [vmem:[#allocation5 + $0xc0] sm:$0xff] }
 0x15d   :  { %1037 = vst [vmem:[#allocation7 + $0x88] sm:$0xff] %v989_v56  ;;  %v988_v31 = vsel %vm940_vm1, %v844_v41, 0.0  ;;  %1143 = vrsqrt.f32 %v598_v54  ;;  %v552_v34 = vmax.f32 %v504_v9, 0.0  ;;  %v2863_v60 = vsub.f32 %v2861_v30, %v2862_v5  ;;  %v2873_v56 = vld [vmem:[#allocation24_spill] sm:$0xff]  ;;  %v2361_v30 = vld [vmem:[#allocation5 + $0xd0] sm:$0xff] }
 0x15e   :  { %v791_v27 = vmul.f32 %v2087_v35, %v736_v29  ;;  %1036 = vst [vmem:[#allocation7 + $0x80] sm:$0xff] %v988_v31  ;;  %v847_v12 = vadd.f32 %v2111_v18, %v792_v25  ;;  %vm946_vm7 = vcmp.ge.u32.totalorder %v2313_v8, 429496729  ;;  %1145 = vrsqrt.f32 %v601_v14  ;;  %v2874_v25 = vld [vmem:[#allocation71_spill] sm:$0xff] }
 0x15f   :  { %v739_v47 = vmul.f32 %v1134_v53, %v2863_v60  ;;  %v507_v39 = vsub.f32 %v411_v7, %v2864_v21  ;;  %v2867_v11 = vsub.f32 %v2865_v16, %v2866_v49  ;;  %v600_v55 = vadd.f32 1e-12, %v552_v34  ;;  %v1138_v46 = vpop.eup %1137  ;;  %v307_v34 = vpop.xlane.xlu0 %306 }
 0x160   :  { %v846_v10 = vadd.f32 %v2111_v18, %v791_v27  ;;  %v410_v33 = vmul.f32 0.0078125, %v295_v38  ;;  %v991_v22 = vsel %vm943_vm2, %v847_v12, 0.0  ;;  %v413_v50 = vmul.f32 0.0078125, %v301_v15  ;;  %v2868_v38 = vld [vmem:[#allocation83_spill] sm:$0xff]  ;;  %v1140_v20 = vpop.eup %1139 }
 0x161   :  { %v738_v32 = vmul.f32 %v1136_v37, %v2867_v11  ;;  %v794_v45 = vmul.f32 %v2087_v35, %v739_v47  ;;  %v555_v7 = vmax.f32 %v507_v39, 0.0  ;;  %1039 = vst [vmem:[#allocation7 + $0x98] sm:$0xff] %v991_v22  ;;  %1147 = vrsqrt.f32 %v600_v55  ;;  %v2877_v22 = vld [vmem:[#allocation25_spill] sm:$0xff] }
 0x162   :  { %v990_v44 = vsel %vm942_vm3, %v846_v10, 0.0  ;;  %v506_v6 = vsub.f32 %v410_v33, %v2868_v38  ;;  %v2871_v42 = vsub.f32 %v2869_v48, %v2870_v4  ;;  %vm949_vm8 = vcmp.ge.u32.totalorder %v2333_v26, 429496729  ;;  %v2881_v38 = vld [vmem:[#allocation73_spill] sm:$0xff] }
 0x163   :  { %v793_v3 = vmul.f32 %v2087_v35, %v738_v32  ;;  %1038 = vst [vmem:[#allocation7 + $0x90] sm:$0xff] %v990_v44  ;;  %v849_v41 = vadd.f32 %v2111_v18, %v794_v45  ;;  %v603_v29 = vadd.f32 1e-12, %v555_v7  ;;  %v509_v54 = vsub.f32 %v413_v50, %v2872_v1  ;;  %v313_v32 = vpop.xlane.xlu1 %312  ;;  %v2878_v45 = vld [vmem:[#allocation72_spill] sm:$0xff]  ;;  %v311_v44 = vpop.xlane.xlu0 %310 }
 0x164   :  { %v741_v15 = vmul.f32 %v1138_v46, %v2871_v42  ;;  %v2875_v14 = vsub.f32 %v2873_v56, %v2874_v25  ;;  %vm948_vm9 = vcmp.ge.u32.totalorder %v2338_v61, 429496729  ;;  %v554_v31 = vmax.f32 %v506_v6, 0.0  ;;  %v2373_v50 = vld [vmem:[#allocation5 + $0xe8] sm:$0xff]  ;;  %v2883_v42 = vld [vmem:[#allocation27_spill] sm:$0xff] }
 0x165   :  { %v848_v9 = vadd.f32 %v2111_v18, %v793_v3  ;;  %v412_v27 = vmul.f32 0.0078125, %v299_v51  ;;  %v993_v37 = vsel %vm945_vm4, %v849_v41, 0.0  ;;  %vm951_vm10 = vcmp.ge.u32.totalorder %v2343_v23, 429496729  ;;  %v2876_v51 = vld [vmem:[#allocation85_spill] sm:$0xff]  ;;  %v1142_v10 = vpop.eup %1141 }
 0x166   :  { %v740_v53 = vmul.f32 %v1140_v20, %v2875_v14  ;;  %v796_v12 = vmul.f32 %v2087_v35, %v741_v15  ;;  %1149 = vrsqrt.f32 %v603_v29  ;;  %v557_v5 = vmax.f32 %v509_v54, 0.0  ;;  %1041 = vst [vmem:[#allocation7 + $0xa8] sm:$0xff] %v993_v37  ;;  %v2884_v15 = vld [vmem:[#allocation74_spill] sm:$0xff] }
 0x167   :  { %v992_v60 = vsel %vm944_vm5, %v848_v9, 0.0  ;;  %v602_v21 = vadd.f32 1e-12, %v554_v31  ;;  %v508_v39 = vsub.f32 %v412_v27, %v2876_v51  ;;  %v415_v49 = vmul.f32 0.0078125, %v305_v62  ;;  %v1144_v55 = vpop.eup %1143  ;;  %v2389_v9 = vld [vmem:[#allocation5 + $0xe0] sm:$0xff]  ;;  %v317_v8 = vpop.xlane.xlu1 %316  ;;  %v2394_v27 = vld [vmem:[#allocation5 + $0xf8] sm:$0xff] }
 0x168   :  { %v795_v47 = vmul.f32 %v2087_v35, %v740_v53  ;;  %1040 = vst [vmem:[#allocation7 + $0xa0] sm:$0xff] %v992_v60  ;;  %v851_v2 = vadd.f32 %v2111_v18, %v796_v12  ;;  %v605_v16 = vadd.f32 1e-12, %v557_v5  ;;  %v414_v11 = vmul.f32 0.0078125, %v303_v57  ;;  %v1146_v3 = vpop.eup %1145  ;;  %v2880_v57 = vld [vmem:[#allocation26_spill] sm:$0xff]  ;;  %v315_v12 = vpop.xlane.xlu0 %314  ;;  %v2886_v60 = vld [vmem:[#allocation28_spill] sm:$0xff] }
 0x169   :  { %v2879_v43 = vsub.f32 %v2877_v22, %v2878_v45  ;;  %vm950_vm11 = vcmp.ge.u32.totalorder %v2361_v30, 429496729  ;;  %1151 = vrsqrt.f32 %v602_v21  ;;  %v556_v46 = vmax.f32 %v508_v39, 0.0  ;;  %v2410_v22 = vld [vmem:[#allocation5 + $0xf0] sm:$0xff] }
 0x16a   :  { %v850_v33 = vadd.f32 %v2111_v18, %v795_v47  ;;  %v995_v62 = vsel %vm947_vm6, %v851_v2, 0.0  ;;  %v2882_v6 = vsub.f32 %v2880_v57, %v2881_v38  ;;  %1153 = vrsqrt.f32 %v605_v16  ;;  %v2887_v47 = vld [vmem:[#allocation75_spill] sm:$0xff]  ;;  %v2900_v30 = vld [vmem:[#allocation53_spill] sm:$0xff] }
 0x16b   :  { %v743_v7 = vmul.f32 %v1142_v10, %v2879_v43  ;;  %v511_v41 = vsub.f32 %v415_v49, %v1968_v19  ;;  %1043 = vst [vmem:[#allocation7 + $0xb8] sm:$0xff] %v995_v62  ;;  %v2885_v29 = vsub.f32 %v2883_v42, %v2884_v15  ;;  %v604_v54 = vadd.f32 1e-12, %v556_v46  ;;  %v1148_v14 = vpop.eup %1147  ;;  %v2889_v2 = vld [vmem:[#allocation87_spill] sm:$0xff]  ;;  %v2890_v49 = vld [vmem:[#allocation88_spill] sm:$0xff]  ;;  %v321_v45 = vpop.xlane.xlu1 %320 }
 0x16c   :  { %v742_v20 = vmul.f32 %v1144_v55, %v2882_v6  ;;  %v994_v48 = vsel %vm946_vm7, %v850_v33, 0.0  ;;  %vm953_vm12 = vcmp.ge.u32.totalorder %v2373_v50, 429496729  ;;  %v510_v19 = vsub.f32 %v414_v11, %v1974_v40  ;;  %v2892_v46 = vld [vmem:[#allocation76_spill] sm:$0xff] }
 0x16d   :  { %v798_v4 = vmul.f32 %v2087_v35, %v743_v7  ;;  %v745_v1 = vmul.f32 %v1146_v3, %v2885_v29  ;;  %1042 = vst [vmem:[#allocation7 + $0xb0] sm:$0xff] %v994_v48  ;;  %v559_v56 = vmax.f32 %v511_v41, 0.0  ;;  %v417_v25 = vmul.f32 0.0078125, %v309_v36  ;;  %v2891_v7 = vld [vmem:[#allocation29_spill] sm:$0xff]  ;;  %v319_v29 = vpop.xlane.xlu0 %318 }
 0x16e   :  { %v797_v28 = vmul.f32 %v2087_v35, %v742_v20  ;;  %1155 = vrsqrt.f32 %v604_v54  ;;  %v416_v37 = vmul.f32 0.0078125, %v307_v34  ;;  %v2888_v21 = vsub.f32 %v2886_v60, %v2887_v47 }
 0x16f   :  { %v853_v53 = vadd.f32 %v2111_v18, %v798_v4  ;;  %v800_v31 = vmul.f32 %v2087_v35, %v745_v1  ;;  %v607_v39 = vadd.f32 1e-12, %v559_v56  ;;  %v558_v40 = vmax.f32 %v510_v19, 0.0  ;;  %v2420_v4 = vld [vmem:[#allocation5 + $0x108] sm:$0xff]  ;;  %v2895_v56 = vld [vmem:[#allocation77_spill] sm:$0xff] }
 0x170   :  { %v852_v5 = vadd.f32 %v2111_v18, %v797_v28  ;;  %v744_v51 = vmul.f32 %v1148_v14, %v2888_v21  ;;  %vm952_vm13 = vcmp.ge.u32.totalorder %v2389_v9, 429496729  ;;  %v513_v16 = vsub.f32 %v417_v25, %v2889_v2  ;;  %v1150_v11 = vpop.eup %1149  ;;  %v2894_v28 = vld [vmem:[#allocation30_spill] sm:$0xff] }
 0x171   :  { %v997_v36 = vsel %vm949_vm8, %v853_v53, 0.0  ;;  %v855_v10 = vadd.f32 %v2111_v18, %v800_v31  ;;  %v512_v34 = vsub.f32 %v416_v37, %v2890_v49  ;;  %vm955_vm14 = vcmp.ge.u32.totalorder %v2394_v27, 429496729  ;;  %v2897_v53 = vld [vmem:[#allocation31_spill] sm:$0xff]  ;;  %v2898_v31 = vld [vmem:[#allocation42_spill] sm:$0xff] }
 0x172   :  { %1045 = vst [vmem:[#allocation7 + $0xc8] sm:$0xff] %v997_v36  ;;  %v996_v55 = vsel %vm948_vm9, %v852_v5, 0.0  ;;  %v799_v33 = vmul.f32 %v2087_v35, %v744_v51  ;;  %1157 = vrsqrt.f32 %v607_v39  ;;  %v606_v26 = vadd.f32 1e-12, %v558_v40  ;;  %v2433_v5 = vld [vmem:[#allocation5 + $0x100] sm:$0xff] }
 0x173   :  { %1044 = vst [vmem:[#allocation7 + $0xc0] sm:$0xff] %v996_v55  ;;  %v999_v43 = vsel %vm951_vm10, %v855_v10, 0.0  ;;  %v2893_v3 = vsub.f32 %v2891_v7, %v2892_v46  ;;  %v561_v57 = vmax.f32 %v513_v16, 0.0  ;;  %v560_v61 = vmax.f32 %v512_v34, 0.0  ;;  %v1152_v41 = vpop.eup %1151  ;;  %v2901_v16 = vld [vmem:[#allocation32_spill] sm:$0xff]  ;;  %v2902_v49 = vld [vmem:[#allocation43_spill] sm:$0xff] }
 0x174   :  { %1047 = vst [vmem:[#allocation7 + $0xd8] sm:$0xff] %v999_v43  ;;  %v854_v38 = vadd.f32 %v2111_v18, %v799_v33  ;;  %1159 = vrsqrt.f32 %v606_v26  ;;  %v419_v6 = vmul.f32 0.0078125, %v313_v32  ;;  %v418_v20 = vmul.f32 0.0078125, %v311_v44  ;;  %v1154_v1 = vpop.eup %1153  ;;  %v2446_v55 = vld [vmem:[#allocation5 + $0x118] sm:$0xff]  ;;  %v2449_v43 = vld [vmem:[#allocation5 + $0x110] sm:$0xff] }
 0x175   :  { %v747_v62 = vmul.f32 %v1150_v11, %v2893_v3  ;;  %vm954_vm15 = vcmp.ge.u32.totalorder %v2410_v22, 429496729  ;;  %v609_v23 = vadd.f32 1e-12, %v561_v57  ;;  %v608_v42 = vadd.f32 1e-12, %v560_v61  ;;  %v323_v3 = vpop.xlane.xlu0 %322 }
 0x176   :  { %v421_v15 = vmul.f32 0.0078125, %v317_v8  ;;  %v998_v54 = vsel %vm950_vm11, %v854_v38, 0.0  ;;  %v2896_v19 = vsub.f32 %v2894_v28, %v2895_v56  ;;  %v515_v44 = vsub.f32 %v419_v6, %v2003_v13  ;;  %v2910_v22 = vld [vmem:[#allocation35_spill] sm:$0xff] }
 0x177   :  { %v802_v48 = vmul.f32 %v2087_v35, %v747_v62  ;;  %v514_v25 = vsub.f32 %v418_v20, %v2014_v24  ;;  %1046 = vst [vmem:[#allocation7 + $0xd0] sm:$0xff] %v998_v54  ;;  %v2899_v37 = vsub.f32 %v2897_v53, %v2898_v31  ;;  %1161 = vrsqrt.f32 %v609_v23  ;;  %v325_v24 = vpop.xlane.xlu1 %324  ;;  %v2904_v20 = vld [vmem:[#allocation33_spill] sm:$0xff] }
 0x178   :  { %v746_v32 = vmul.f32 %v1152_v41, %v2896_v19  ;;  %v517_v60 = vsub.f32 %v421_v15, %v2900_v30  ;;  %vm957_vm0 = vcmp.ge.u32.totalorder %v2420_v4, 429496729  ;;  %1163 = vrsqrt.f32 %v608_v42  ;;  %v1156_v51 = vpop.eup %1155  ;;  %v2905_v41 = vld [vmem:[#allocation44_spill] sm:$0xff]  ;;  %v2908_v54 = vld [vmem:[#allocation81_spill] sm:$0xff]  ;;  %v2477_v30 = vld [vmem:[#allocation5 + $0x138] sm:$0xff] }
 0x179   :  { %v857_v14 = vadd.f32 %v2111_v18, %v802_v48  ;;  %v749_v8 = vmul.f32 %v1154_v1, %v2899_v37  ;;  %v563_v13 = vmax.f32 %v515_v44, 0.0  ;;  %v562_v21 = vmax.f32 %v514_v25, 0.0  ;;  %v2907_v1 = vld [vmem:[#allocation34_spill] sm:$0xff]  ;;  %v2469_v19 = vld [vmem:[#allocation5 + $0x128] sm:$0xff] }
 0x17a   :  { %v801_v47 = vmul.f32 %v2087_v35, %v746_v32  ;;  %v565_v36 = vmax.f32 %v517_v60, 0.0  ;;  %v420_v10 = vmul.f32 0.0078125, %v315_v12  ;;  %v2903_v34 = vsub.f32 %v2901_v16, %v2902_v49  ;;  %v2913_v16 = vld [vmem:[#allocation36_spill] sm:$0xff]  ;;  %v2914_v49 = vld [vmem:[#allocation46_spill] sm:$0xff] }
 0x17b   :  { %v1001_v39 = vsel %vm953_vm12, %v857_v14, 0.0  ;;  %v804_v40 = vmul.f32 %v2087_v35, %v749_v8  ;;  %vm956_vm1 = vcmp.ge.u32.totalorder %v2433_v5, 429496729  ;;  %v611_v33 = vadd.f32 1e-12, %v563_v13  ;;  %v329_v15 = vpop.xlane.xlu1 %328  ;;  %v2473_v14 = vld [vmem:[#allocation5 + $0x120] sm:$0xff] }
 0x17c   :  { %1049 = vst [vmem:[#allocation7 + $0xe8] sm:$0xff] %v1001_v39  ;;  %v856_v2 = vadd.f32 %v2111_v18, %v801_v47  ;;  %v748_v11 = vmul.f32 %v1156_v51, %v2903_v34  ;;  %v610_v26 = vadd.f32 1e-12, %v562_v21  ;;  %v613_v7 = vadd.f32 1e-12, %v565_v36  ;;  %v1158_v62 = vpop.eup %1157  ;;  %v327_v47 = vpop.xlane.xlu0 %326  ;;  %v2911_v21 = vld [vmem:[#allocation45_spill] sm:$0xff] }
 0x17d   :  { %v859_v50 = vadd.f32 %v2111_v18, %v804_v40  ;;  %v516_v12 = vsub.f32 %v420_v10, %v2029_v59  ;;  %v423_v46 = vmul.f32 0.0078125, %v321_v45  ;;  %1165 = vrsqrt.f32 %v611_v33 }
 0x17e   :  { %v1000_v57 = vsel %vm952_vm13, %v856_v2, 0.0  ;;  %v803_v61 = vmul.f32 %v2087_v35, %v748_v11  ;;  %v422_v38 = vmul.f32 0.0078125, %v319_v29  ;;  %v2906_v48 = vsub.f32 %v2904_v20, %v2905_v41  ;;  %v1160_v45 = vpop.eup %1159  ;;  %v2916_v41 = vld [vmem:[#allocation37_spill] sm:$0xff] }
 0x17f   :  { %1048 = vst [vmem:[#allocation7 + $0xe0] sm:$0xff] %v1000_v57  ;;  %v1003_v6 = vsel %vm955_vm14, %v859_v50, 0.0  ;;  %vm959_vm2 = vcmp.ge.u32.totalorder %v2446_v55, 429496729  ;;  %1167 = vrsqrt.f32 %v610_v26  ;;  %v564_v59 = vmax.f32 %v516_v12, 0.0  ;;  %v2494_v26 = vld [vmem:[#allocation5 + $0x130] sm:$0xff]  ;;  %v333_v50 = vpop.xlane.xlu1 %332 }
 0x180   :  { %v751_v23 = vmul.f32 %v1158_v62, %v2906_v48  ;;  %1051 = vst [vmem:[#allocation7 + $0xf8] sm:$0xff] %v1003_v6  ;;  %v858_v9 = vadd.f32 %v2111_v18, %v803_v61  ;;  %vm958_vm3 = vcmp.ge.u32.totalorder %v2449_v43, 429496729  ;;  %1169 = vrsqrt.f32 %v613_v7  ;;  %v2917_v48 = vld [vmem:[#allocation86_spill] sm:$0xff]  ;;  %v2923_v55 = vld [vmem:[#allocation89_spill] sm:$0xff] }
 0x181   :  { %v519_v42 = vsub.f32 %v423_v46, %v2036_v0  ;;  %v518_v27 = vsub.f32 %v422_v38, %v2062_v63  ;;  %v2909_v28 = vsub.f32 %v2907_v1, %v2908_v54  ;;  %v612_v32 = vadd.f32 1e-12, %v564_v59  ;;  %v1162_v63 = vpop.eup %1161  ;;  %v331_v59 = vpop.xlane.xlu0 %330  ;;  %v2516_v1 = vld [vmem:[%s2591_s1] ss:$0 sm:$0xff] }
 0x182   :  { %v806_v29 = vmul.f32 %v2087_v35, %v751_v23  ;;  %v425_v44 = vmul.f32 0.0078125, %v325_v24  ;;  %v1002_v25 = vsel %vm954_vm15, %v858_v9, 0.0  ;;  %v424_v31 = vmul.f32 0.0078125, %v323_v3  ;;  %v1164_v13 = vpop.eup %1163 }
 0x183   :  { %v750_v56 = vmul.f32 %v1160_v45, %v2909_v28  ;;  %v567_v53 = vmax.f32 %v519_v42, 0.0  ;;  %v566_v0 = vmax.f32 %v518_v27, 0.0  ;;  %1050 = vst [vmem:[#allocation7 + $0xf0] sm:$0xff] %v1002_v25  ;;  %1171 = vrsqrt.f32 %v612_v32  ;;  %v2919_v42 = vld [vmem:[#allocation38_spill] sm:$0xff]  ;;  %v2922_v28 = vld [vmem:[#allocation39_spill] sm:$0xff] }
 0x184   :  { %v861_v37 = vadd.f32 %v2111_v18, %v806_v29  ;;  %v521_v60 = vsub.f32 %v425_v44, %v2066_v52  ;;  %v2912_v24 = vsub.f32 %v2910_v22, %v2911_v21  ;;  %vm961_vm4 = vcmp.ge.u32.totalorder %v2469_v19, 429496729  ;;  %v2920_v27 = vld [vmem:[#allocation50_spill] sm:$0xff] }
 0x185   :  { %v805_v8 = vmul.f32 %v2087_v35, %v750_v56  ;;  %v615_v39 = vadd.f32 1e-12, %v567_v53  ;;  %v614_v40 = vadd.f32 1e-12, %v566_v0  ;;  %v520_v36 = vsub.f32 %v424_v31, %v2078_v58  ;;  %v2925_v44 = vld [vmem:[#allocation98_spill] sm:$0xff]  ;;  %v2926_v31 = vld [vmem:[#allocation12_spill] sm:$0xff] }
 0x186   :  { %v753_v51 = vmul.f32 %v1162_v63, %v2912_v24  ;;  %v1005_v10 = vsel %vm957_vm0, %v861_v37, 0.0  ;;  %v2915_v52 = vsub.f32 %v2913_v16, %v2914_v49  ;;  %vm960_vm5 = vcmp.ge.u32.totalorder %v2473_v14, 429496729 }
 0x187   :  { %v860_v2 = vadd.f32 %v2111_v18, %v805_v8  ;;  %v569_v11 = vmax.f32 %v521_v60, 0.0  ;;  %1053 = vst [vmem:[#allocation7 + $0x108] sm:$0xff] %v1005_v10  ;;  %vm963_vm6 = vcmp.ge.u32.totalorder %v2477_v30, 429496729  ;;  %1173 = vrsqrt.f32 %v615_v39  ;;  %v1166_v3 = vpop.eup %1165  ;;  %v2927_v8 = vld [vmem:[#allocation99_spill] sm:$0xff]  ;;  %v2929_v39 = vld [vmem:[#allocation90_spill] sm:$0xff] }
 0x188   :  { %v752_v34 = vmul.f32 %v1164_v13, %v2915_v52  ;;  %v808_v33 = vmul.f32 %v2087_v35, %v753_v51  ;;  %v568_v58 = vmax.f32 %v520_v36, 0.0  ;;  %v427_v4 = vmul.f32 0.0078125, %v329_v15  ;;  %v2928_v51 = vld [vmem:[#allocation40_spill] sm:$0xff]  ;;  %v2936_v30 = vld [vmem:[#allocation94_spill] sm:$0xff] }
 0x189   :  { %v1004_v7 = vsel %vm956_vm1, %v860_v2, 0.0  ;;  %1175 = vrsqrt.f32 %v614_v40  ;;  %v617_v46 = vadd.f32 1e-12, %v569_v11  ;;  %v426_v38 = vmul.f32 0.0078125, %v327_v47  ;;  %v1168_v6 = vpop.eup %1167  ;;  %v2530_v47 = vld [vmem:[%s2592_s2] ss:$0 sm:$0xff] }
 0x18a   :  { %v807_v12 = vmul.f32 %v2087_v35, %v752_v34  ;;  %1052 = vst [vmem:[#allocation7 + $0x100] sm:$0xff] %v1004_v7  ;;  %v863_v62 = vadd.f32 %v2111_v18, %v808_v33  ;;  %v616_v57 = vadd.f32 1e-12, %v568_v58  ;;  %v523_v61 = vsub.f32 %v427_v4, %v2082_v17  ;;  %v1170_v45 = vpop.eup %1169  ;;  %v1191_v11 = vld [vmem:[#allocation2 + $0x140] sm:$0xff]  ;;  %v2931_v33 = vld [vmem:[#allocation92_spill] sm:$0xff]  ;;  %s1274_s2 = smov [#allocation7]  }
 0x18b   :  { %v2918_v23 = vsub.f32 %v2916_v41, %v2917_v48  ;;  %vm962_vm7 = vcmp.ge.u32.totalorder %v2494_v26, 429496729  ;;  %1177 = vrsqrt.f32 %v617_v46  ;;  %v429_v35 = vmul.f32 0.0078125, %v333_v50  ;;  %v917_v46 = vld [vmem:[#allocation5 + $0x148] sm:$0xff]  ;;  %v916_v48 = vld [vmem:[#allocation5 + $0x140] sm:$0xff]  ;;  %s1073_s20 = sshll.u32 %s1274_s2, 4  ;;  %s1074_s20 = int_to_ptr.vmem [resolvable:$true] %s1073_s20 }
 0x18c   :  { %v862_v20 = vadd.f32 %v2111_v18, %v807_v12  ;;  %v1007_v9 = vsel %vm959_vm2, %v863_v62, 0.0  ;;  %v2921_v17 = vsub.f32 %v2919_v42, %v2920_v27  ;;  %1179 = vrsqrt.f32 %v616_v57  ;;  %v2933_v62 = vld [vmem:[#allocation91_spill] sm:$0xff]  ;;  %s1242_s21 = scalar_lea.vmem %s1074_s20, 6144  ;;  %p1247_p3 = scmp.lt.s32.totalorder %s1074_s20, %s1074_s20 }
 0x18d   :  { %v755_v5 = vmul.f32 %v1166_v3, %v2918_v23  ;;  %v571_v29 = vmax.f32 %v523_v61, 0.0  ;;  %1055 = vst [vmem:[#allocation7 + $0x118] sm:$0xff] %v1007_v9  ;;  %v2924_v56 = vsub.f32 %v2922_v28, %v2923_v55  ;;  %v522_v25 = vsub.f32 %v426_v38, %v2925_v44  ;;  %v1172_v37 = vpop.eup %1171  ;;  %v2932_v3 = vld [vmem:[#allocation41_spill] sm:$0xff]  ;;  %v2937_v44 = vld [vmem:[#allocation95_spill] sm:$0xff]  ;;  %p1243_p2 = scmp.ne.s32.totalorder %s1074_s20, %s1242_s21  ;;  %p1248_p4 = scmp.lt.s32.totalorder %s1242_s21, %s1242_s21 }
 0x18e   :  { %v754_v15 = vmul.f32 %v1168_v6, %v2921_v17  ;;  %v1006_v18 = vsel %vm958_vm3, %v862_v20, 0.0  ;;  %v525_v43 = vsub.f32 %v429_v35, %v2926_v31  ;;  %v428_v63 = vmul.f32 0.0078125, %v331_v59  ;;  %v1192_v6 = vld [vmem:[#allocation2 + $0x158] sm:$0xff]  ;;  %v2935_v20 = vld [vmem:[#allocation93_spill] sm:$0xff] }
 0x18f   :  { %v810_v54 = vmul.f32 %v2516_v1, %v755_v5  ;;  %v757_v32 = vmul.f32 %v1170_v45, %v2924_v56  ;;  %1054 = vst [vmem:[#allocation7 + $0x110] sm:$0xff] %v1006_v18  ;;  %v619_v0 = vadd.f32 1e-12, %v571_v29  ;;  %v476_v60 = vmul.f32 %v2927_v8, %v2927_v8  ;;  %v1193_v35 = vld [vmem:[#allocation2 + $0x150] sm:$0xff]  ;;  %p1249_p5 = por %p1248_p4, %p1247_p3 }
 0x190   :  { %v809_v53 = vmul.f32 %v2516_v1, %v754_v15  ;;  %v570_v21 = vmax.f32 %v522_v25, 0.0  ;;  %v2930_v40 = vsub.f32 %v2928_v51, %v2929_v39  ;;  %v573_v10 = vmax.f32 %v525_v43, 0.0  ;;  %v919_v15 = vld [vmem:[#allocation5 + $0x158] sm:$0xff] }
 0x191   :  { %v865_v13 = vadd.f32 %v2530_v47, %v810_v54  ;;  %v812_v22 = vmul.f32 %v2516_v1, %v757_v32  ;;  %1181 = vrsqrt.f32 %v619_v0  ;;  %v524_v52 = vsub.f32 %v428_v63, %v476_v60  ;;  %v1174_v34 = vpop.eup %1173  ;;  %v918_v54 = vld [vmem:[#allocation5 + $0x150] sm:$0xff]  ;;  %v1194_v32 = vld [vmem:[#allocation2 + $0x168] sm:$0xff]  ;;  %v1196_v39 = vld [vmem:[#allocation2 + $0x178] sm:$0xff]  ;;  %p1250_p6 = pnand %p1249_p5, %p1243_p2 }
 0x192   :  { %v864_v24 = vadd.f32 %v2530_v47, %v809_v53  ;;  %v756_v36 = vmul.f32 %v1172_v37, %v2930_v40  ;;  %v618_v49 = vadd.f32 1e-12, %v570_v21  ;;  %v710_v58 = vsub.f32 %v1191_v11, %v2931_v33  ;;  %v921_v37 = vld [vmem:[#allocation5 + $0x168] sm:$0xff]  ;;  %v2939_v40 = vld [vmem:[#allocation97_spill] sm:$0xff]  ;;  %v923_v11 = vld [vmem:[#allocation5 + $0x178] sm:$0xff] }
 0x193   :  { %v1009_v2 = vsel %vm961_vm4, %v865_v13, 0.0  ;;  %v867_v16 = vadd.f32 %v2530_v47, %v812_v22  ;;  %v621_v7 = vadd.f32 1e-12, %v573_v10  ;;  %v1176_v12 = vpop.eup %1175  ;;  %v2934_v57 = vsub.f32 %v2932_v3, %v2933_v62  ;;  %v1195_v13 = vld [vmem:[#allocation2 + $0x160] sm:$0xff]  ;;  %v2938_v22 = vld [vmem:[#allocation96_spill] sm:$0xff]  ;;  %v922_v3 = vld [vmem:[#allocation5 + $0x170] sm:$0xff] }
 0x194   :  { %1057 = vst [vmem:[#allocation7 + $0x128] sm:$0xff] %v1009_v2  ;;  %v1008_v4 = vsel %vm960_vm5, %v864_v24, 0.0  ;;  %v811_v50 = vmul.f32 %v2516_v1, %v756_v36  ;;  %1183 = vrsqrt.f32 %v618_v49  ;;  %v572_v38 = vmax.f32 %v524_v52, 0.0  ;;  %v920_v49 = vld [vmem:[#allocation5 + $0x160] sm:$0xff] }
 0x195   :  { %1056 = vst [vmem:[#allocation7 + $0x120] sm:$0xff] %v1008_v4  ;;  %v1011_v19 = vsel %vm963_vm6, %v867_v16, 0.0  ;;  %v759_v61 = vmul.f32 %v1174_v34, %v2934_v57  ;;  %v713_v41 = vsub.f32 %v1192_v6, %v2935_v20  ;;  %v758_v23 = vmul.f32 %v1176_v12, %v710_v58  ;;  %v1178_v5 = vpop.eup %1177  ;;  %v1197_v58 = vld [vmem:[#allocation2 + $0x170] sm:$0xff] }
 0x196   :  { %1059 = vst [vmem:[#allocation7 + $0x138] sm:$0xff] %v1011_v19  ;;  %v866_v14 = vadd.f32 %v2530_v47, %v811_v50  ;;  %1185 = vrsqrt.f32 %v621_v7  ;;  %v712_v59 = vsub.f32 %v1193_v35, %v2936_v30  ;;  %v620_v9 = vadd.f32 1e-12, %v572_v38  ;;  %v1180_v42 = vpop.eup %1179 }
 0x197   :  { %v814_v45 = vmul.f32 %v2516_v1, %v759_v61  ;;  %vm965_vm8 = vcmp.ge.u32.totalorder %v917_v46, 429496729  ;;  %v813_v17 = vmul.f32 %v2516_v1, %v758_v23  ;;  %v761_v29 = vmul.f32 %v1178_v5, %v713_v41 }
 0x198   :  { %v1010_v27 = vsel %vm962_vm7, %v866_v14, 0.0  ;;  %vm964_vm9 = vcmp.ge.u32.totalorder %v916_v48, 429496729  ;;  %v760_v28 = vmul.f32 %v1180_v42, %v712_v59  ;;  %1187 = vrsqrt.f32 %v620_v9 }
 0x199   :  { %1058 = vst [vmem:[#allocation7 + $0x130] sm:$0xff] %v1010_v27  ;;  %v869_v18 = vadd.f32 %v2530_v47, %v814_v45  ;;  %v868_v55 = vadd.f32 %v2530_v47, %v813_v17  ;;  %v816_v56 = vmul.f32 %v2516_v1, %v761_v29  ;;  %v715_v26 = vsub.f32 %v1194_v32, %v2937_v44 }
 0x19a   :  { %vm967_vm10 = vcmp.ge.u32.totalorder %v919_v15, 429496729  ;;  %v815_v53 = vmul.f32 %v2516_v1, %v760_v28  ;;  %vm966_vm11 = vcmp.ge.u32.totalorder %v918_v54, 429496729  ;;  %v714_v21 = vsub.f32 %v1195_v13, %v2938_v22 }
 0x19b   :  { %v1013_v25 = vsel %vm965_vm8, %v869_v18, 0.0  ;;  %v1182_v0 = vpop.eup %1181  ;;  %v1012_v31 = vsel %vm964_vm9, %v868_v55, 0.0  ;;  %v871_v43 = vadd.f32 %v2530_v47, %v816_v56  ;;  %v717_v36 = vsub.f32 %v1196_v39, %v2939_v40 }
 0x19c   :  { %1061 = vst [vmem:[#allocation7 + $0x148] sm:$0xff] %v1013_v25  ;;  %1060 = vst [vmem:[#allocation7 + $0x140] sm:$0xff] %v1012_v31  ;;  %v870_v63 = vadd.f32 %v2530_v47, %v815_v53  ;;  %v763_v60 = vmul.f32 %v1182_v0, %v715_v26  ;;  %vm969_vm12 = vcmp.ge.u32.totalorder %v921_v37, 429496729  ;;  %v716_v4 = vsub.f32 %v1197_v58, %v2927_v8 }
 0x19d   :  { %v1015_v24 = vsel %vm967_vm10, %v871_v43, 0.0  ;;  %vm968_vm13 = vcmp.ge.u32.totalorder %v920_v49, 429496729  ;;  %vm971_vm14 = vcmp.ge.u32.totalorder %v923_v11, 429496729 }
 0x19e   :  { %v1184_v51 = vpop.eup %1183  ;;  %1063 = vst [vmem:[#allocation7 + $0x158] sm:$0xff] %v1015_v24  ;;  %v1014_v10 = vsel %vm966_vm11, %v870_v63, 0.0  ;;  %v818_v2 = vmul.f32 %v2516_v1, %v763_v60  ;;  %vm970_vm15 = vcmp.ge.u32.totalorder %v922_v3, 429496729 }
 0x19f   :  { %1062 = vst [vmem:[#allocation7 + $0x150] sm:$0xff] %v1014_v10  ;;  %v762_v52 = vmul.f32 %v1184_v51, %v714_v21 }
 0x1a0   :  { %v1186_v16 = vpop.eup %1185  ;;  %v873_v34 = vadd.f32 %v2530_v47, %v818_v2 }
 0x1a1   :  { %v765_v33 = vmul.f32 %v1186_v16, %v717_v36  ;;  %v817_v50 = vmul.f32 %v2516_v1, %v762_v52 }
 0x1a2   :  { %v1188_v7 = vpop.eup %1187  ;;  %v1017_v12 = vsel %vm969_vm12, %v873_v34, 0.0 }
 0x1a3   :  { %v820_v19 = vmul.f32 %v2516_v1, %v765_v33  ;;  %1065 = vst [vmem:[#allocation7 + $0x168] sm:$0xff] %v1017_v12  ;;  %v872_v46 = vadd.f32 %v2530_v47, %v817_v50  ;;  %v764_v62 = vmul.f32 %v1188_v7, %v716_v4 }
 0x1a5   :  { %v875_v57 = vadd.f32 %v2530_v47, %v820_v19  ;;  %v1016_v61 = vsel %vm968_vm13, %v872_v46, 0.0  ;;  %v819_v38 = vmul.f32 %v2516_v1, %v764_v62 }
 0x1a6   :  { %1064 = vst [vmem:[#allocation7 + $0x160] sm:$0xff] %v1016_v61 }
 0x1a7   :  { %v1019_v8 = vsel %vm971_vm14, %v875_v57, 0.0  ;;  %v874_v6 = vadd.f32 %v2530_v47, %v819_v38 }
 0x1a8   :  { %1067 = vst [vmem:[#allocation7 + $0x178] sm:$0xff] %v1019_v8 }
 0x1a9   :  { %v1018_v20 = vsel %vm970_vm15, %v874_v6, 0.0 }
 0x1aa   :  { %1066 = vst [vmem:[#allocation7 + $0x170] sm:$0xff] %v1018_v20 }
 0x1ab   :  { %1253 = shalt.err (!%p1250_p6)
}
 0x1ac   :  { %s1254_s24 = scalar_lea.hbm %s2594_s4, 6144 }
 0x1ad   :  { %p1255_p7 = scmp.ne.s32.totalorder %s2594_s4, %s1254_s24  ;;  %p1258_p8 = scmp.lt.u32.totalorder %s1254_s24, %s2594_s4 }
 0x1af   :  { %p1260_p9 = pnand %p1258_p8, %p1255_p7 }
 0x1b1   :  { %1263 = shalt.err (!%p1260_p9)
}
 0x1b2   :  { %1079 = dma.vmem_to_hbm [thread:$0]  %s1074_s20, 6144, %s2594_s4, [#allocation4], %s1271_s25, %s1271_s25, %s1272_s26  }
 0x1b3   :  { %1268 = dma.done.wait [#allocation4], 6144  }
 0x1b4   :  { %1269 = vsyncadd [#allocation4], 4294961152 }
 0x1b5   :  { %1083 = vsyncpa [#allocation3], 1 }
 0x1b6   :  { %1084 = vsyncpa [#allocation6], 1 }
 0x1b7   :  { %1085 = vsyncpa [#allocation4], 1 }

</bundles_post_ra>
